<compile_context>
chip_gen: v7x
topology: tpu7x:2x2x1
jax: 0.10.0
libtpu: 0.0.40
codegen_flags: <defaults>
</compile_context>

<pallas_src>
import jax
import jax.numpy as jnp
import numpy as np
from jax import lax
from jax.experimental import pallas as pl
from jax.experimental.pallas import tpu as pltpu

GATE_PAD = 128   # each GRU gate gets its own 128-lane group
BATCH_TILE = 8   # sublane tile; also the per-grid-program batch tile


def gru_kernel(x_ref, h0_ref, wih_ref, whh_ref, bih_ref, bhhn_ref,
               out_ref, gi_ref):
    """Full GRU recurrence for one batch tile.

    x_ref:    (T*BT, D)   time-major inputs for this batch tile
    h0_ref:   (BT, G)     initial hidden, gate lanes padded to G=128
    wih_ref:  (D, 3G)     W_ih^T, gate-padded
    whh_ref:  (G, 3G)     W_hh^T, gate-padded (pad rows/cols zero)
    bih_ref:  (1, 3G)     b_ih with b_hh's r/z slices folded in
    bhhn_ref: (1, G)      b_hh new-gate slice only
    out_ref:  (BT, T*G)   h_t for every step, batch-first, lane-dense
    gi_ref:   (T*BT, 3G)  VMEM scratch for the hoisted input projection
    """
    BT, G = h0_ref.shape
    T = x_ref.shape[0] // BT

    # Hoist the input projection off the recurrent critical path: one batched
    # MXU matmul for all timesteps, parked in VMEM scratch (not in vregs).
    gi_ref[...] = (jnp.dot(x_ref[...], wih_ref[...],
                           preferred_element_type=jnp.float32)
                   + bih_ref[...])

    h = h0_ref[...]                                     # (BT, G) = one f32 vreg
    bhh_n = jnp.broadcast_to(bhhn_ref[...], (BT, G))    # hoisted broadcast

    for t in range(T):  # T static & small -> fully unrolled, static slices
        gi = gi_ref[t * BT:(t + 1) * BT, :]             # aligned (BT, 3G) load
        gh = jnp.dot(h, whh_ref[...], preferred_element_type=jnp.float32)

        # PyTorch GRU gate order along 3G: [reset, update, new], each gate in
        # its own 128-lane group (no cross-lane rotates on the serial chain).
        r = jax.nn.sigmoid(gi[:, 0:G] + gh[:, 0:G])
        z = jax.nn.sigmoid(gi[:, G:2 * G] + gh[:, G:2 * G])
        n = jnp.tanh(gi[:, 2 * G:3 * G] + r * (gh[:, 2 * G:3 * G] + bhh_n))
        h = (1.0 - z) * n + z * h

        # One lane-dense store per step (off the critical path, overlaps with
        # the next step's matmul); no register-resident concat.
        out_ref[:, t * G:(t + 1) * G] = h.astype(out_ref.dtype)


def prepare_encoder_params(params, hidden_size):
    """One-time padding / transpose / bias-fusion of GRU parameters."""
    H = hidden_size
    G = GATE_PAD
    w_ih, w_hh = params["w_ih"], params["w_hh"]
    b_ih, b_hh = params["b_ih"], params["b_hh"]

    def pad_gate_cols(w_t):  # (K, 3H) -> (K, 3G): each gate in its own 128-lane group
        K = w_t.shape[0]
        w3 = w_t.reshape(K, 3, H)
        return jnp.zeros((K, 3, G), w_t.dtype).at[:, :, :H].set(w3).reshape(K, 3 * G)

    wih_p = pad_gate_cols(jnp.transpose(w_ih, (1, 0)))                       # (D, 3G)
    whh_p = jnp.zeros((G, 3 * G), jnp.float32).at[:H, :].set(
        pad_gate_cols(jnp.transpose(w_hh, (1, 0))))                          # (G, 3G)

    # Fold b_hh's reset/update slices into the hoisted input-projection bias;
    # keep only the new-gate recurrent bias (added inside r * (.) per PyTorch).
    b_fused = b_ih.at[:2 * H].add(b_hh[:2 * H])                              # (3H,)
    bih_p = (jnp.zeros((3, G), jnp.float32)
             .at[:, :H].set(b_fused.reshape(3, H)).reshape(1, 3 * G))        # (1, 3G)
    bhhn_p = jnp.zeros((1, G), jnp.float32).at[0, :H].set(b_hh[2 * H:])      # (1, G)

    return {"wih_p": wih_p, "whh_p": whh_p, "bih_p": bih_p, "bhhn_p": bhhn_p}


@jax.jit
def encoder_rnn_forward(inputs, hidden, prep):
    """inputs: (B, T, D_in) f32, hidden: (1, B, H) f32, prep: prepared params.
    Returns (output (B, T, H), state (1, B, H)) — same semantics as
    EncoderRNN.forward with dnn_layers=0, layers=1, bi=False."""
    B, T, D_in = inputs.shape
    H = hidden.shape[-1]
    G = GATE_PAD
    BT = BATCH_TILE
    Bp = ((B + BT - 1) // BT) * BT
    NB = Bp // BT

    # Batch padded to tiles of BT; within a tile the rows are time-major:
    # global row = bt*T*BT + t*BT + b_local (contiguous per grid program).
    x_pad = jnp.zeros((Bp, T, D_in), jnp.float32).at[:B].set(inputs)
    x_p = (x_pad.reshape(NB, BT, T, D_in)
                .transpose(0, 2, 1, 3)
                .reshape(NB * T * BT, D_in))

    h0_p = jnp.zeros((Bp, G), jnp.float32).at[:B, :H].set(hidden[0])

    out_p = pl.pallas_call(
        gru_kernel,
        out_shape=jax.ShapeDtypeStruct((Bp, T * G), jnp.float32),
        grid_spec=pltpu.PrefetchScalarGridSpec(
            num_scalar_prefetch=0,
            grid=(NB,),  # batch tiles; each runs its own in-kernel recurrence
            in_specs=[
                pl.BlockSpec((T * BT, D_in), lambda bt: (bt, 0)),   # x (time-major)
                pl.BlockSpec((BT, G), lambda bt: (bt, 0)),          # h0
                pl.BlockSpec((D_in, 3 * G), lambda bt: (0, 0)),     # W_ih^T
                pl.BlockSpec((G, 3 * G), lambda bt: (0, 0)),        # W_hh^T
                pl.BlockSpec((1, 3 * G), lambda bt: (0, 0)),        # fused b_ih
                pl.BlockSpec((1, G), lambda bt: (0, 0)),            # b_hh (new gate)
            ],
            out_specs=pl.BlockSpec((BT, T * G), lambda bt: (bt, 0)),
            scratch_shapes=[pltpu.VMEM((T * BT, 3 * G), jnp.float32)],  # gi scratch
        ),
        compiler_params=pltpu.CompilerParams(
            dimension_semantics=("parallel",)),
    )(x_p, h0_p, prep["wih_p"], prep["whh_p"], prep["bih_p"], prep["bhhn_p"])

    # Batch-first output straight from the kernel layout; strip padding.
    output = out_p.reshape(Bp, T, G)[:B, :, :H]           # (B, T, H)
    state = output[:, -1, :][None]                        # (1, B, H) = final hidden
    return output, state


def gru_reference(inputs, hidden, params):
    """Plain-JAX reference (same math as torch.nn.GRU, batch_first)."""
    w_ih, w_hh, b_ih, b_hh = params["w_ih"], params["w_hh"], params["b_ih"], params["b_hh"]
    H = hidden.shape[-1]
    h0 = hidden[0]

    def step(h, x_t):
        gi = x_t @ w_ih.T + b_ih
        gh = h @ w_hh.T + b_hh
        r = jax.nn.sigmoid(gi[:, :H] + gh[:, :H])
        z = jax.nn.sigmoid(gi[:, H:2 * H] + gh[:, H:2 * H])
        n = jnp.tanh(gi[:, 2 * H:] + r * gh[:, 2 * H:])
        h_new = (1.0 - z) * n + z * h
        return h_new, h_new

    x_tm = jnp.transpose(inputs, (1, 0, 2))
    h_last, out_tm = lax.scan(step, h0, x_tm)
    return jnp.transpose(out_tm, (1, 0, 2)), h_last[None]


if __name__ == "__main__":
    # Config / shapes.
    B, T = 2, 8
    D_in = 4        # n_channels
    H = 32          # encoder_hidden

    key = jax.random.PRNGKey(0)
    k1, k2, k3, k4, k5 = jax.random.split(key, 5)

    # Deterministic parameter init (PyTorch-style uniform(-1/sqrt(H), 1/sqrt(H))).
    bound = 1.0 / np.sqrt(H)
    params = {
        "w_ih": jax.random.uniform(k1, (3 * H, D_in), jnp.float32, -bound, bound),
        "w_hh": jax.random.uniform(k2, (3 * H, H), jnp.float32, -bound, bound),
        "b_ih": jax.random.uniform(k3, (3 * H,), jnp.float32, -bound, bound),
        "b_hh": jax.random.uniform(k4, (3 * H,), jnp.float32, -bound, bound),
    }

    inputs = jax.random.normal(k5, (B, T, D_in), jnp.float32)
    hidden = jnp.zeros((1, B, H), jnp.float32)          # EncoderRNN.init_hidden
    input_lengths = jnp.full((B,), T, jnp.int32)        # unused by reference forward

    prep = prepare_encoder_params(params, H)            # one-time weight prep
    output, state = encoder_rnn_forward(inputs, hidden, prep)
    output = jax.block_until_ready(output)
    state = jax.block_until_ready(state)

    ref_out, ref_state = gru_reference(inputs, hidden, params)
    np.testing.assert_allclose(np.asarray(output), np.asarray(ref_out),
                               rtol=1e-5, atol=1e-4)
    np.testing.assert_allclose(np.asarray(state), np.asarray(ref_state),
                               rtol=1e-5, atol=1e-4)

    print("KERNEL_OK")
</pallas_src>

<mosaic_0001>
module attributes {stable_mosaic.version = 11 : i64} {
  func.func @gru_kernel(%arg0: i32, %arg1: memref<64x4xf32, #tpu.memory_space<vmem>>, %arg2: memref<8x128xf32, #tpu.memory_space<vmem>>, %arg3: memref<4x384xf32, #tpu.memory_space<vmem>>, %arg4: memref<128x384xf32, #tpu.memory_space<vmem>>, %arg5: memref<1x384xf32, #tpu.memory_space<vmem>>, %arg6: memref<1x128xf32, #tpu.memory_space<vmem>>, %arg7: memref<8x1024xf32, #tpu.memory_space<vmem>>, %arg8: memref<64x384xf32, #tpu.memory_space<vmem>>) attributes {dimension_semantics = [#tpu.dimension_semantics<parallel>], iteration_bounds = array<i64: 1>, scalar_prefetch = 0 : i64, scratch_operands = 1 : i64, tpu.core_type = #tpu.core_type<tc>, window_params = [{transform_indices = @transform_0, window_bounds = array<i64: 64, 4>}, {transform_indices = @transform_1, window_bounds = array<i64: 8, 128>}, {pipeline_mode = #tpu.pipeline_mode<synchronous>, transform_indices = @transform_2, window_bounds = array<i64: 4, 384>}, {pipeline_mode = #tpu.pipeline_mode<synchronous>, transform_indices = @transform_3, window_bounds = array<i64: 128, 384>}, {pipeline_mode = #tpu.pipeline_mode<synchronous>, transform_indices = @transform_4, window_bounds = array<i64: 1, 384>}, {pipeline_mode = #tpu.pipeline_mode<synchronous>, transform_indices = @transform_5, window_bounds = array<i64: 1, 128>}, {transform_indices = @transform_6, window_bounds = array<i64: 8, 1024>}]} {
    %c0 = arith.constant 0 : index
    %c0_0 = arith.constant 0 : index
    %0 = vector.load %arg1[%c0, %c0_0] : memref<64x4xf32, #tpu.memory_space<vmem>>, vector<64x4xf32>
    %c0_1 = arith.constant 0 : index
    %c0_2 = arith.constant 0 : index
    %1 = vector.load %arg3[%c0_1, %c0_2] : memref<4x384xf32, #tpu.memory_space<vmem>>, vector<4x384xf32>
    %cst = arith.constant dense<0.000000e+00> : vector<64x384xf32>
    %2 = tpu.matmul %0, %1, %cst {dimension_numbers = #tpu.dot_dimension_numbers<[1], [0], [0], [1], [0, 0, 1, 1], [], []>} : vector<64x4xf32>, vector<4x384xf32>, vector<64x384xf32> -> vector<64x384xf32>
    %c0_3 = arith.constant 0 : index
    %c0_4 = arith.constant 0 : index
    %3 = vector.load %arg5[%c0_3, %c0_4] : memref<1x384xf32, #tpu.memory_space<vmem>>, vector<1x384xf32>
    %4 = vector.broadcast %3 : vector<1x384xf32> to vector<64x384xf32>
    %5 = arith.addf %2, %4 : vector<64x384xf32>
    %c0_5 = arith.constant 0 : index
    %c0_6 = arith.constant 0 : index
    %6 = vector.load %arg8[%c0_5, %c0_6] : memref<64x384xf32, #tpu.memory_space<vmem>>, vector<64x384xf32>
    tpu.vector_store %arg8[%c0_5, %c0_6], %5 {strides = array<i32>} : memref<64x384xf32, #tpu.memory_space<vmem>>, vector<64x384xf32>,
    %c0_7 = arith.constant 0 : index
    %c0_8 = arith.constant 0 : index
    %7 = vector.load %arg2[%c0_7, %c0_8] : memref<8x128xf32, #tpu.memory_space<vmem>>, vector<8x128xf32>
    %c0_9 = arith.constant 0 : index
    %c0_10 = arith.constant 0 : index
    %8 = vector.load %arg6[%c0_9, %c0_10] : memref<1x128xf32, #tpu.memory_space<vmem>>, vector<1x128xf32>
    %9 = vector.shape_cast %8 : vector<1x128xf32> to vector<1x128xf32>
    %10 = vector.broadcast %9 : vector<1x128xf32> to vector<8x128xf32>
    %c0_11 = arith.constant 0 : index
    %c0_12 = arith.constant 0 : index
    %11 = vector.load %arg8[%c0_11, %c0_12] : memref<64x384xf32, #tpu.memory_space<vmem>>, vector<8x384xf32>
    %c0_13 = arith.constant 0 : index
    %c0_14 = arith.constant 0 : index
    %12 = vector.load %arg4[%c0_13, %c0_14] : memref<128x384xf32, #tpu.memory_space<vmem>>, vector<128x384xf32>
    %cst_15 = arith.constant dense<0.000000e+00> : vector<8x384xf32>
    %13 = tpu.matmul %7, %12, %cst_15 {dimension_numbers = #tpu.dot_dimension_numbers<[1], [0], [0], [1], [0, 0, 1, 1], [], []>} : vector<8x128xf32>, vector<128x384xf32>, vector<8x384xf32> -> vector<8x384xf32>
    %14 = vector.extract_strided_slice %11 {offsets = [0, 0], sizes = [8, 128], strides = [1, 1]} : vector<8x384xf32> to vector<8x128xf32>
    %15 = vector.extract_strided_slice %13 {offsets = [0, 0], sizes = [8, 128], strides = [1, 1]} : vector<8x384xf32> to vector<8x128xf32>
    %16 = arith.addf %14, %15 : vector<8x128xf32>
    %17 = arith.negf %16 : vector<8x128xf32>
    %18 = math.exp %17 : vector<8x128xf32>
    %cst_16 = arith.constant 1.000000e+00 : f32
    %19 = vector.broadcast %cst_16 : f32 to vector<8x128xf32>
    %20 = arith.addf %19, %18 : vector<8x128xf32>
    %21 = arith.divf %19, %20 : vector<8x128xf32>
    %22 = vector.extract_strided_slice %11 {offsets = [0, 128], sizes = [8, 128], strides = [1, 1]} : vector<8x384xf32> to vector<8x128xf32>
    %23 = vector.extract_strided_slice %13 {offsets = [0, 128], sizes = [8, 128], strides = [1, 1]} : vector<8x384xf32> to vector<8x128xf32>
    %24 = arith.addf %22, %23 : vector<8x128xf32>
    %25 = arith.negf %24 : vector<8x128xf32>
    %26 = math.exp %25 : vector<8x128xf32>
    %cst_17 = arith.constant 1.000000e+00 : f32
    %27 = vector.broadcast %cst_17 : f32 to vector<8x128xf32>
    %28 = arith.addf %27, %26 : vector<8x128xf32>
    %29 = arith.divf %27, %28 : vector<8x128xf32>
    %30 = vector.extract_strided_slice %11 {offsets = [0, 256], sizes = [8, 128], strides = [1, 1]} : vector<8x384xf32> to vector<8x128xf32>
    %31 = vector.extract_strided_slice %13 {offsets = [0, 256], sizes = [8, 128], strides = [1, 1]} : vector<8x384xf32> to vector<8x128xf32>
    %32 = arith.addf %31, %10 : vector<8x128xf32>
    %33 = arith.mulf %21, %32 : vector<8x128xf32>
    %34 = arith.addf %30, %33 : vector<8x128xf32>
    %35 = math.tanh %34 : vector<8x128xf32>
    %cst_18 = arith.constant 1.000000e+00 : f32
    %36 = vector.broadcast %cst_18 : f32 to vector<8x128xf32>
    %37 = arith.subf %36, %29 : vector<8x128xf32>
    %38 = arith.mulf %37, %35 : vector<8x128xf32>
    %39 = arith.mulf %29, %7 : vector<8x128xf32>
    %40 = arith.addf %38, %39 : vector<8x128xf32>
    %c0_19 = arith.constant 0 : index
    %c0_20 = arith.constant 0 : index
    %41 = vector.load %arg7[%c0_19, %c0_20] : memref<8x1024xf32, #tpu.memory_space<vmem>>, vector<8x128xf32>
    tpu.vector_store %arg7[%c0_19, %c0_20], %40 {strides = array<i32>} : memref<8x1024xf32, #tpu.memory_space<vmem>>, vector<8x128xf32>,
    %c8 = arith.constant 8 : index
    %c0_21 = arith.constant 0 : index
    %42 = vector.load %arg8[%c8, %c0_21] : memref<64x384xf32, #tpu.memory_space<vmem>>, vector<8x384xf32>
    %c0_22 = arith.constant 0 : index
    %c0_23 = arith.constant 0 : index
    %43 = vector.load %arg4[%c0_22, %c0_23] : memref<128x384xf32, #tpu.memory_space<vmem>>, vector<128x384xf32>
    %cst_24 = arith.constant dense<0.000000e+00> : vector<8x384xf32>
    %44 = tpu.matmul %40, %43, %cst_24 {dimension_numbers = #tpu.dot_dimension_numbers<[1], [0], [0], [1], [0, 0, 1, 1], [], []>} : vector<8x128xf32>, vector<128x384xf32>, vector<8x384xf32> -> vector<8x384xf32>
    %45 = vector.extract_strided_slice %42 {offsets = [0, 0], sizes = [8, 128], strides = [1, 1]} : vector<8x384xf32> to vector<8x128xf32>
    %46 = vector.extract_strided_slice %44 {offsets = [0, 0], sizes = [8, 128], strides = [1, 1]} : vector<8x384xf32> to vector<8x128xf32>
    %47 = arith.addf %45, %46 : vector<8x128xf32>
    %48 = arith.negf %47 : vector<8x128xf32>
    %49 = math.exp %48 : vector<8x128xf32>
    %cst_25 = arith.constant 1.000000e+00 : f32
    %50 = vector.broadcast %cst_25 : f32 to vector<8x128xf32>
    %51 = arith.addf %50, %49 : vector<8x128xf32>
    %52 = arith.divf %50, %51 : vector<8x128xf32>
    %53 = vector.extract_strided_slice %42 {offsets = [0, 128], sizes = [8, 128], strides = [1, 1]} : vector<8x384xf32> to vector<8x128xf32>
    %54 = vector.extract_strided_slice %44 {offsets = [0, 128], sizes = [8, 128], strides = [1, 1]} : vector<8x384xf32> to vector<8x128xf32>
    %55 = arith.addf %53, %54 : vector<8x128xf32>
    %56 = arith.negf %55 : vector<8x128xf32>
    %57 = math.exp %56 : vector<8x128xf32>
    %cst_26 = arith.constant 1.000000e+00 : f32
    %58 = vector.broadcast %cst_26 : f32 to vector<8x128xf32>
    %59 = arith.addf %58, %57 : vector<8x128xf32>
    %60 = arith.divf %58, %59 : vector<8x128xf32>
    %61 = vector.extract_strided_slice %42 {offsets = [0, 256], sizes = [8, 128], strides = [1, 1]} : vector<8x384xf32> to vector<8x128xf32>
    %62 = vector.extract_strided_slice %44 {offsets = [0, 256], sizes = [8, 128], strides = [1, 1]} : vector<8x384xf32> to vector<8x128xf32>
    %63 = arith.addf %62, %10 : vector<8x128xf32>
    %64 = arith.mulf %52, %63 : vector<8x128xf32>
    %65 = arith.addf %61, %64 : vector<8x128xf32>
    %66 = math.tanh %65 : vector<8x128xf32>
    %cst_27 = arith.constant 1.000000e+00 : f32
    %67 = vector.broadcast %cst_27 : f32 to vector<8x128xf32>
    %68 = arith.subf %67, %60 : vector<8x128xf32>
    %69 = arith.mulf %68, %66 : vector<8x128xf32>
    %70 = arith.mulf %60, %40 : vector<8x128xf32>
    %71 = arith.addf %69, %70 : vector<8x128xf32>
    %c0_28 = arith.constant 0 : index
    %c128 = arith.constant 128 : index
    %72 = vector.load %arg7[%c0_28, %c128] : memref<8x1024xf32, #tpu.memory_space<vmem>>, vector<8x128xf32>
    tpu.vector_store %arg7[%c0_28, %c128], %71 {strides = array<i32>} : memref<8x1024xf32, #tpu.memory_space<vmem>>, vector<8x128xf32>,
    %c16 = arith.constant 16 : index
    %c0_29 = arith.constant 0 : index
    %73 = vector.load %arg8[%c16, %c0_29] : memref<64x384xf32, #tpu.memory_space<vmem>>, vector<8x384xf32>
    %c0_30 = arith.constant 0 : index
    %c0_31 = arith.constant 0 : index
    %74 = vector.load %arg4[%c0_30, %c0_31] : memref<128x384xf32, #tpu.memory_space<vmem>>, vector<128x384xf32>
    %cst_32 = arith.constant dense<0.000000e+00> : vector<8x384xf32>
    %75 = tpu.matmul %71, %74, %cst_32 {dimension_numbers = #tpu.dot_dimension_numbers<[1], [0], [0], [1], [0, 0, 1, 1], [], []>} : vector<8x128xf32>, vector<128x384xf32>, vector<8x384xf32> -> vector<8x384xf32>
    %76 = vector.extract_strided_slice %73 {offsets = [0, 0], sizes = [8, 128], strides = [1, 1]} : vector<8x384xf32> to vector<8x128xf32>
    %77 = vector.extract_strided_slice %75 {offsets = [0, 0], sizes = [8, 128], strides = [1, 1]} : vector<8x384xf32> to vector<8x128xf32>
    %78 = arith.addf %76, %77 : vector<8x128xf32>
    %79 = arith.negf %78 : vector<8x128xf32>
    %80 = math.exp %79 : vector<8x128xf32>
    %cst_33 = arith.constant 1.000000e+00 : f32
    %81 = vector.broadcast %cst_33 : f32 to vector<8x128xf32>
    %82 = arith.addf %81, %80 : vector<8x128xf32>
    %83 = arith.divf %81, %82 : vector<8x128xf32>
    %84 = vector.extract_strided_slice %73 {offsets = [0, 128], sizes = [8, 128], strides = [1, 1]} : vector<8x384xf32> to vector<8x128xf32>
    %85 = vector.extract_strided_slice %75 {offsets = [0, 128], sizes = [8, 128], strides = [1, 1]} : vector<8x384xf32> to vector<8x128xf32>
    %86 = arith.addf %84, %85 : vector<8x128xf32>
    %87 = arith.negf %86 : vector<8x128xf32>
    %88 = math.exp %87 : vector<8x128xf32>
    %cst_34 = arith.constant 1.000000e+00 : f32
    %89 = vector.broadcast %cst_34 : f32 to vector<8x128xf32>
    %90 = arith.addf %89, %88 : vector<8x128xf32>
    %91 = arith.divf %89, %90 : vector<8x128xf32>
    %92 = vector.extract_strided_slice %73 {offsets = [0, 256], sizes = [8, 128], strides = [1, 1]} : vector<8x384xf32> to vector<8x128xf32>
    %93 = vector.extract_strided_slice %75 {offsets = [0, 256], sizes = [8, 128], strides = [1, 1]} : vector<8x384xf32> to vector<8x128xf32>
    %94 = arith.addf %93, %10 : vector<8x128xf32>
    %95 = arith.mulf %83, %94 : vector<8x128xf32>
    %96 = arith.addf %92, %95 : vector<8x128xf32>
    %97 = math.tanh %96 : vector<8x128xf32>
    %cst_35 = arith.constant 1.000000e+00 : f32
    %98 = vector.broadcast %cst_35 : f32 to vector<8x128xf32>
    %99 = arith.subf %98, %91 : vector<8x128xf32>
    %100 = arith.mulf %99, %97 : vector<8x128xf32>
    %101 = arith.mulf %91, %71 : vector<8x128xf32>
    %102 = arith.addf %100, %101 : vector<8x128xf32>
    %c0_36 = arith.constant 0 : index
    %c256 = arith.constant 256 : index
    %103 = vector.load %arg7[%c0_36, %c256] : memref<8x1024xf32, #tpu.memory_space<vmem>>, vector<8x128xf32>
    tpu.vector_store %arg7[%c0_36, %c256], %102 {strides = array<i32>} : memref<8x1024xf32, #tpu.memory_space<vmem>>, vector<8x128xf32>,
    %c24 = arith.constant 24 : index
    %c0_37 = arith.constant 0 : index
    %104 = vector.load %arg8[%c24, %c0_37] : memref<64x384xf32, #tpu.memory_space<vmem>>, vector<8x384xf32>
    %c0_38 = arith.constant 0 : index
    %c0_39 = arith.constant 0 : index
    %105 = vector.load %arg4[%c0_38, %c0_39] : memref<128x384xf32, #tpu.memory_space<vmem>>, vector<128x384xf32>
    %cst_40 = arith.constant dense<0.000000e+00> : vector<8x384xf32>
    %106 = tpu.matmul %102, %105, %cst_40 {dimension_numbers = #tpu.dot_dimension_numbers<[1], [0], [0], [1], [0, 0, 1, 1], [], []>} : vector<8x128xf32>, vector<128x384xf32>, vector<8x384xf32> -> vector<8x384xf32>
    %107 = vector.extract_strided_slice %104 {offsets = [0, 0], sizes = [8, 128], strides = [1, 1]} : vector<8x384xf32> to vector<8x128xf32>
    %108 = vector.extract_strided_slice %106 {offsets = [0, 0], sizes = [8, 128], strides = [1, 1]} : vector<8x384xf32> to vector<8x128xf32>
    %109 = arith.addf %107, %108 : vector<8x128xf32>
    %110 = arith.negf %109 : vector<8x128xf32>
    %111 = math.exp %110 : vector<8x128xf32>
    %cst_41 = arith.constant 1.000000e+00 : f32
    %112 = vector.broadcast %cst_41 : f32 to vector<8x128xf32>
    %113 = arith.addf %112, %111 : vector<8x128xf32>
    %114 = arith.divf %112, %113 : vector<8x128xf32>
    %115 = vector.extract_strided_slice %104 {offsets = [0, 128], sizes = [8, 128], strides = [1, 1]} : vector<8x384xf32> to vector<8x128xf32>
    %116 = vector.extract_strided_slice %106 {offsets = [0, 128], sizes = [8, 128], strides = [1, 1]} : vector<8x384xf32> to vector<8x128xf32>
    %117 = arith.addf %115, %116 : vector<8x128xf32>
    %118 = arith.negf %117 : vector<8x128xf32>
    %119 = math.exp %118 : vector<8x128xf32>
    %cst_42 = arith.constant 1.000000e+00 : f32
    %120 = vector.broadcast %cst_42 : f32 to vector<8x128xf32>
    %121 = arith.addf %120, %119 : vector<8x128xf32>
    %122 = arith.divf %120, %121 : vector<8x128xf32>
    %123 = vector.extract_strided_slice %104 {offsets = [0, 256], sizes = [8, 128], strides = [1, 1]} : vector<8x384xf32> to vector<8x128xf32>
    %124 = vector.extract_strided_slice %106 {offsets = [0, 256], sizes = [8, 128], strides = [1, 1]} : vector<8x384xf32> to vector<8x128xf32>
    %125 = arith.addf %124, %10 : vector<8x128xf32>
    %126 = arith.mulf %114, %125 : vector<8x128xf32>
    %127 = arith.addf %123, %126 : vector<8x128xf32>
    %128 = math.tanh %127 : vector<8x128xf32>
    %cst_43 = arith.constant 1.000000e+00 : f32
    %129 = vector.broadcast %cst_43 : f32 to vector<8x128xf32>
    %130 = arith.subf %129, %122 : vector<8x128xf32>
    %131 = arith.mulf %130, %128 : vector<8x128xf32>
    %132 = arith.mulf %122, %102 : vector<8x128xf32>
    %133 = arith.addf %131, %132 : vector<8x128xf32>
    %c0_44 = arith.constant 0 : index
    %c384 = arith.constant 384 : index
    %134 = vector.load %arg7[%c0_44, %c384] : memref<8x1024xf32, #tpu.memory_space<vmem>>, vector<8x128xf32>
    tpu.vector_store %arg7[%c0_44, %c384], %133 {strides = array<i32>} : memref<8x1024xf32, #tpu.memory_space<vmem>>, vector<8x128xf32>,
    %c32 = arith.constant 32 : index
    %c0_45 = arith.constant 0 : index
    %135 = vector.load %arg8[%c32, %c0_45] : memref<64x384xf32, #tpu.memory_space<vmem>>, vector<8x384xf32>
    %c0_46 = arith.constant 0 : index
    %c0_47 = arith.constant 0 : index
    %136 = vector.load %arg4[%c0_46, %c0_47] : memref<128x384xf32, #tpu.memory_space<vmem>>, vector<128x384xf32>
    %cst_48 = arith.constant dense<0.000000e+00> : vector<8x384xf32>
    %137 = tpu.matmul %133, %136, %cst_48 {dimension_numbers = #tpu.dot_dimension_numbers<[1], [0], [0], [1], [0, 0, 1, 1], [], []>} : vector<8x128xf32>, vector<128x384xf32>, vector<8x384xf32> -> vector<8x384xf32>
    %138 = vector.extract_strided_slice %135 {offsets = [0, 0], sizes = [8, 128], strides = [1, 1]} : vector<8x384xf32> to vector<8x128xf32>
    %139 = vector.extract_strided_slice %137 {offsets = [0, 0], sizes = [8, 128], strides = [1, 1]} : vector<8x384xf32> to vector<8x128xf32>
    %140 = arith.addf %138, %139 : vector<8x128xf32>
    %141 = arith.negf %140 : vector<8x128xf32>
    %142 = math.exp %141 : vector<8x128xf32>
    %cst_49 = arith.constant 1.000000e+00 : f32
    %143 = vector.broadcast %cst_49 : f32 to vector<8x128xf32>
    %144 = arith.addf %143, %142 : vector<8x128xf32>
    %145 = arith.divf %143, %144 : vector<8x128xf32>
    %146 = vector.extract_strided_slice %135 {offsets = [0, 128], sizes = [8, 128], strides = [1, 1]} : vector<8x384xf32> to vector<8x128xf32>
    %147 = vector.extract_strided_slice %137 {offsets = [0, 128], sizes = [8, 128], strides = [1, 1]} : vector<8x384xf32> to vector<8x128xf32>
    %148 = arith.addf %146, %147 : vector<8x128xf32>
    %149 = arith.negf %148 : vector<8x128xf32>
    %150 = math.exp %149 : vector<8x128xf32>
    %cst_50 = arith.constant 1.000000e+00 : f32
    %151 = vector.broadcast %cst_50 : f32 to vector<8x128xf32>
    %152 = arith.addf %151, %150 : vector<8x128xf32>
    %153 = arith.divf %151, %152 : vector<8x128xf32>
    %154 = vector.extract_strided_slice %135 {offsets = [0, 256], sizes = [8, 128], strides = [1, 1]} : vector<8x384xf32> to vector<8x128xf32>
    %155 = vector.extract_strided_slice %137 {offsets = [0, 256], sizes = [8, 128], strides = [1, 1]} : vector<8x384xf32> to vector<8x128xf32>
    %156 = arith.addf %155, %10 : vector<8x128xf32>
    %157 = arith.mulf %145, %156 : vector<8x128xf32>
    %158 = arith.addf %154, %157 : vector<8x128xf32>
    %159 = math.tanh %158 : vector<8x128xf32>
    %cst_51 = arith.constant 1.000000e+00 : f32
    %160 = vector.broadcast %cst_51 : f32 to vector<8x128xf32>
    %161 = arith.subf %160, %153 : vector<8x128xf32>
    %162 = arith.mulf %161, %159 : vector<8x128xf32>
    %163 = arith.mulf %153, %133 : vector<8x128xf32>
    %164 = arith.addf %162, %163 : vector<8x128xf32>
    %c0_52 = arith.constant 0 : index
    %c512 = arith.constant 512 : index
    %165 = vector.load %arg7[%c0_52, %c512] : memref<8x1024xf32, #tpu.memory_space<vmem>>, vector<8x128xf32>
    tpu.vector_store %arg7[%c0_52, %c512], %164 {strides = array<i32>} : memref<8x1024xf32, #tpu.memory_space<vmem>>, vector<8x128xf32>,
    %c40 = arith.constant 40 : index
    %c0_53 = arith.constant 0 : index
    %166 = vector.load %arg8[%c40, %c0_53] : memref<64x384xf32, #tpu.memory_space<vmem>>, vector<8x384xf32>
    %c0_54 = arith.constant 0 : index
    %c0_55 = arith.constant 0 : index
    %167 = vector.load %arg4[%c0_54, %c0_55] : memref<128x384xf32, #tpu.memory_space<vmem>>, vector<128x384xf32>
    %cst_56 = arith.constant dense<0.000000e+00> : vector<8x384xf32>
    %168 = tpu.matmul %164, %167, %cst_56 {dimension_numbers = #tpu.dot_dimension_numbers<[1], [0], [0], [1], [0, 0, 1, 1], [], []>} : vector<8x128xf32>, vector<128x384xf32>, vector<8x384xf32> -> vector<8x384xf32>
    %169 = vector.extract_strided_slice %166 {offsets = [0, 0], sizes = [8, 128], strides = [1, 1]} : vector<8x384xf32> to vector<8x128xf32>
    %170 = vector.extract_strided_slice %168 {offsets = [0, 0], sizes = [8, 128], strides = [1, 1]} : vector<8x384xf32> to vector<8x128xf32>
    %171 = arith.addf %169, %170 : vector<8x128xf32>
    %172 = arith.negf %171 : vector<8x128xf32>
    %173 = math.exp %172 : vector<8x128xf32>
    %cst_57 = arith.constant 1.000000e+00 : f32
    %174 = vector.broadcast %cst_57 : f32 to vector<8x128xf32>
    %175 = arith.addf %174, %173 : vector<8x128xf32>
    %176 = arith.divf %174, %175 : vector<8x128xf32>
    %177 = vector.extract_strided_slice %166 {offsets = [0, 128], sizes = [8, 128], strides = [1, 1]} : vector<8x384xf32> to vector<8x128xf32>
    %178 = vector.extract_strided_slice %168 {offsets = [0, 128], sizes = [8, 128], strides = [1, 1]} : vector<8x384xf32> to vector<8x128xf32>
    %179 = arith.addf %177, %178 : vector<8x128xf32>
    %180 = arith.negf %179 : vector<8x128xf32>
    %181 = math.exp %180 : vector<8x128xf32>
    %cst_58 = arith.constant 1.000000e+00 : f32
    %182 = vector.broadcast %cst_58 : f32 to vector<8x128xf32>
    %183 = arith.addf %182, %181 : vector<8x128xf32>
    %184 = arith.divf %182, %183 : vector<8x128xf32>
    %185 = vector.extract_strided_slice %166 {offsets = [0, 256], sizes = [8, 128], strides = [1, 1]} : vector<8x384xf32> to vector<8x128xf32>
    %186 = vector.extract_strided_slice %168 {offsets = [0, 256], sizes = [8, 128], strides = [1, 1]} : vector<8x384xf32> to vector<8x128xf32>
    %187 = arith.addf %186, %10 : vector<8x128xf32>
    %188 = arith.mulf %176, %187 : vector<8x128xf32>
    %189 = arith.addf %185, %188 : vector<8x128xf32>
    %190 = math.tanh %189 : vector<8x128xf32>
    %cst_59 = arith.constant 1.000000e+00 : f32
    %191 = vector.broadcast %cst_59 : f32 to vector<8x128xf32>
    %192 = arith.subf %191, %184 : vector<8x128xf32>
    %193 = arith.mulf %192, %190 : vector<8x128xf32>
    %194 = arith.mulf %184, %164 : vector<8x128xf32>
    %195 = arith.addf %193, %194 : vector<8x128xf32>
    %c0_60 = arith.constant 0 : index
    %c640 = arith.constant 640 : index
    %196 = vector.load %arg7[%c0_60, %c640] : memref<8x1024xf32, #tpu.memory_space<vmem>>, vector<8x128xf32>
    tpu.vector_store %arg7[%c0_60, %c640], %195 {strides = array<i32>} : memref<8x1024xf32, #tpu.memory_space<vmem>>, vector<8x128xf32>,
    %c48 = arith.constant 48 : index
    %c0_61 = arith.constant 0 : index
    %197 = vector.load %arg8[%c48, %c0_61] : memref<64x384xf32, #tpu.memory_space<vmem>>, vector<8x384xf32>
    %c0_62 = arith.constant 0 : index
    %c0_63 = arith.constant 0 : index
    %198 = vector.load %arg4[%c0_62, %c0_63] : memref<128x384xf32, #tpu.memory_space<vmem>>, vector<128x384xf32>
    %cst_64 = arith.constant dense<0.000000e+00> : vector<8x384xf32>
    %199 = tpu.matmul %195, %198, %cst_64 {dimension_numbers = #tpu.dot_dimension_numbers<[1], [0], [0], [1], [0, 0, 1, 1], [], []>} : vector<8x128xf32>, vector<128x384xf32>, vector<8x384xf32> -> vector<8x384xf32>
    %200 = vector.extract_strided_slice %197 {offsets = [0, 0], sizes = [8, 128], strides = [1, 1]} : vector<8x384xf32> to vector<8x128xf32>
    %201 = vector.extract_strided_slice %199 {offsets = [0, 0], sizes = [8, 128], strides = [1, 1]} : vector<8x384xf32> to vector<8x128xf32>
    %202 = arith.addf %200, %201 : vector<8x128xf32>
    %203 = arith.negf %202 : vector<8x128xf32>
    %204 = math.exp %203 : vector<8x128xf32>
    %cst_65 = arith.constant 1.000000e+00 : f32
    %205 = vector.broadcast %cst_65 : f32 to vector<8x128xf32>
    %206 = arith.addf %205, %204 : vector<8x128xf32>
    %207 = arith.divf %205, %206 : vector<8x128xf32>
    %208 = vector.extract_strided_slice %197 {offsets = [0, 128], sizes = [8, 128], strides = [1, 1]} : vector<8x384xf32> to vector<8x128xf32>
    %209 = vector.extract_strided_slice %199 {offsets = [0, 128], sizes = [8, 128], strides = [1, 1]} : vector<8x384xf32> to vector<8x128xf32>
    %210 = arith.addf %208, %209 : vector<8x128xf32>
    %211 = arith.negf %210 : vector<8x128xf32>
    %212 = math.exp %211 : vector<8x128xf32>
    %cst_66 = arith.constant 1.000000e+00 : f32
    %213 = vector.broadcast %cst_66 : f32 to vector<8x128xf32>
    %214 = arith.addf %213, %212 : vector<8x128xf32>
    %215 = arith.divf %213, %214 : vector<8x128xf32>
    %216 = vector.extract_strided_slice %197 {offsets = [0, 256], sizes = [8, 128], strides = [1, 1]} : vector<8x384xf32> to vector<8x128xf32>
    %217 = vector.extract_strided_slice %199 {offsets = [0, 256], sizes = [8, 128], strides = [1, 1]} : vector<8x384xf32> to vector<8x128xf32>
    %218 = arith.addf %217, %10 : vector<8x128xf32>
    %219 = arith.mulf %207, %218 : vector<8x128xf32>
    %220 = arith.addf %216, %219 : vector<8x128xf32>
    %221 = math.tanh %220 : vector<8x128xf32>
    %cst_67 = arith.constant 1.000000e+00 : f32
    %222 = vector.broadcast %cst_67 : f32 to vector<8x128xf32>
    %223 = arith.subf %222, %215 : vector<8x128xf32>
    %224 = arith.mulf %223, %221 : vector<8x128xf32>
    %225 = arith.mulf %215, %195 : vector<8x128xf32>
    %226 = arith.addf %224, %225 : vector<8x128xf32>
    %c0_68 = arith.constant 0 : index
    %c768 = arith.constant 768 : index
    %227 = vector.load %arg7[%c0_68, %c768] : memref<8x1024xf32, #tpu.memory_space<vmem>>, vector<8x128xf32>
    tpu.vector_store %arg7[%c0_68, %c768], %226 {strides = array<i32>} : memref<8x1024xf32, #tpu.memory_space<vmem>>, vector<8x128xf32>,
    %c56 = arith.constant 56 : index
    %c0_69 = arith.constant 0 : index
    %228 = vector.load %arg8[%c56, %c0_69] : memref<64x384xf32, #tpu.memory_space<vmem>>, vector<8x384xf32>
    %c0_70 = arith.constant 0 : index
    %c0_71 = arith.constant 0 : index
    %229 = vector.load %arg4[%c0_70, %c0_71] : memref<128x384xf32, #tpu.memory_space<vmem>>, vector<128x384xf32>
    %cst_72 = arith.constant dense<0.000000e+00> : vector<8x384xf32>
    %230 = tpu.matmul %226, %229, %cst_72 {dimension_numbers = #tpu.dot_dimension_numbers<[1], [0], [0], [1], [0, 0, 1, 1], [], []>} : vector<8x128xf32>, vector<128x384xf32>, vector<8x384xf32> -> vector<8x384xf32>
    %231 = vector.extract_strided_slice %228 {offsets = [0, 0], sizes = [8, 128], strides = [1, 1]} : vector<8x384xf32> to vector<8x128xf32>
    %232 = vector.extract_strided_slice %230 {offsets = [0, 0], sizes = [8, 128], strides = [1, 1]} : vector<8x384xf32> to vector<8x128xf32>
    %233 = arith.addf %231, %232 : vector<8x128xf32>
    %234 = arith.negf %233 : vector<8x128xf32>
    %235 = math.exp %234 : vector<8x128xf32>
    %cst_73 = arith.constant 1.000000e+00 : f32
    %236 = vector.broadcast %cst_73 : f32 to vector<8x128xf32>
    %237 = arith.addf %236, %235 : vector<8x128xf32>
    %238 = arith.divf %236, %237 : vector<8x128xf32>
    %239 = vector.extract_strided_slice %228 {offsets = [0, 128], sizes = [8, 128], strides = [1, 1]} : vector<8x384xf32> to vector<8x128xf32>
    %240 = vector.extract_strided_slice %230 {offsets = [0, 128], sizes = [8, 128], strides = [1, 1]} : vector<8x384xf32> to vector<8x128xf32>
    %241 = arith.addf %239, %240 : vector<8x128xf32>
    %242 = arith.negf %241 : vector<8x128xf32>
    %243 = math.exp %242 : vector<8x128xf32>
    %cst_74 = arith.constant 1.000000e+00 : f32
    %244 = vector.broadcast %cst_74 : f32 to vector<8x128xf32>
    %245 = arith.addf %244, %243 : vector<8x128xf32>
    %246 = arith.divf %244, %245 : vector<8x128xf32>
    %247 = vector.extract_strided_slice %228 {offsets = [0, 256], sizes = [8, 128], strides = [1, 1]} : vector<8x384xf32> to vector<8x128xf32>
    %248 = vector.extract_strided_slice %230 {offsets = [0, 256], sizes = [8, 128], strides = [1, 1]} : vector<8x384xf32> to vector<8x128xf32>
    %249 = arith.addf %248, %10 : vector<8x128xf32>
    %250 = arith.mulf %238, %249 : vector<8x128xf32>
    %251 = arith.addf %247, %250 : vector<8x128xf32>
    %252 = math.tanh %251 : vector<8x128xf32>
    %cst_75 = arith.constant 1.000000e+00 : f32
    %253 = vector.broadcast %cst_75 : f32 to vector<8x128xf32>
    %254 = arith.subf %253, %246 : vector<8x128xf32>
    %255 = arith.mulf %254, %252 : vector<8x128xf32>
    %256 = arith.mulf %246, %226 : vector<8x128xf32>
    %257 = arith.addf %255, %256 : vector<8x128xf32>
    %c0_76 = arith.constant 0 : index
    %c896 = arith.constant 896 : index
    %258 = vector.load %arg7[%c0_76, %c896] : memref<8x1024xf32, #tpu.memory_space<vmem>>, vector<8x128xf32>
    tpu.vector_store %arg7[%c0_76, %c896], %257 {strides = array<i32>} : memref<8x1024xf32, #tpu.memory_space<vmem>>, vector<8x128xf32>,
    return
  }
  func.func @transform_0(%arg0: i32) -> (i32, i32) {
    %c0_i32 = arith.constant 0 : i32
    %c0_i32_0 = arith.constant 0 : i32
    return %arg0, %c0_i32 : i32, i32
  }
  func.func @transform_1(%arg0: i32) -> (i32, i32) {
    %c0_i32 = arith.constant 0 : i32
    %c0_i32_0 = arith.constant 0 : i32
    return %arg0, %c0_i32 : i32, i32
  }
  func.func @transform_2(%arg0: i32) -> (i32, i32) {
    %c0_i32 = arith.constant 0 : i32
    %c0_i32_0 = arith.constant 0 : i32
    %c0_i32_1 = arith.constant 0 : i32
    return %c0_i32, %c0_i32_0 : i32, i32
  }
  func.func @transform_3(%arg0: i32) -> (i32, i32) {
    %c0_i32 = arith.constant 0 : i32
    %c0_i32_0 = arith.constant 0 : i32
    %c0_i32_1 = arith.constant 0 : i32
    return %c0_i32, %c0_i32_0 : i32, i32
  }
  func.func @transform_4(%arg0: i32) -> (i32, i32) {
    %c0_i32 = arith.constant 0 : i32
    %c0_i32_0 = arith.constant 0 : i32
    %c0_i32_1 = arith.constant 0 : i32
    return %c0_i32, %c0_i32_0 : i32, i32
  }
  func.func @transform_5(%arg0: i32) -> (i32, i32) {
    %c0_i32 = arith.constant 0 : i32
    %c0_i32_0 = arith.constant 0 : i32
    %c0_i32_1 = arith.constant 0 : i32
    return %c0_i32, %c0_i32_0 : i32, i32
  }
  func.func @transform_6(%arg0: i32) -> (i32, i32) {
    %c0_i32 = arith.constant 0 : i32
    %c0_i32_0 = arith.constant 0 : i32
    return %arg0, %c0_i32 : i32, i32
  }
}

</mosaic_0001>

<bundles_post_ra>
// kernel: encoder_rnn_forward.1
= control target key start
LH: loop header
LB: loop body
LE: loop exit
PB: predicated region body
PF: predicated region fallthrough
CT: control target
= control target key end

     0   :  { %11 = vsyncpa [#allocation4], 0  ;;  %s3140_s21 = smov [#allocation3]   ;;  %s3740_s0 = inlined_call_operand.vmem [shape: f32[64,4], index: 0, kind: input, shape index: {}]   ;;  %s3741_s1 = inlined_call_operand.vmem [shape: f32[8,128], index: 1, kind: input, shape index: {}]   ;;  %s3742_s2 = inlined_call_operand.vmem [shape: f32[4,384], index: 2, kind: input, shape index: {}]   ;;  %s3743_s3 = inlined_call_operand.hbm [shape: f32[128,384], index: 3, kind: input, shape index: {}]   ;;  %s3744_s4 = inlined_call_operand.vmem [shape: f32[1,384], index: 4, kind: input, shape index: {}]   ;;  %s3745_s5 = inlined_call_operand.vmem [shape: f32[1,128], index: 5, kind: input, shape index: {}]   ;;  %s3746_s6 = inlined_call_operand.vmem [shape: f32[8,1024], index: 6, kind: output, shape index: {}]  }
   0x1   :  { %s23_s22 = sshll.u32 %s3140_s21, 4  ;;  %s3116_s25 = scalar_lea.hbm %s3743_s3, 6144  ;;  %s24_s22 = int_to_ptr.vmem [resolvable:$true] %s23_s22 }
   0x2   :  { %p3117_p0 = scmp.ne.s32.totalorder %s3743_s3, %s3116_s25  ;;  %p3120_p1 = scmp.lt.u32.totalorder %s3116_s25, %s3743_s3 }
   0x4   :  { %p3122_p2 = pnand %p3120_p1, %p3117_p0 }
   0x6   :  { %3125 = shalt.err (!%p3122_p2)
}
   0x7   :  { %s3126_s30 = scalar_lea.vmem %s24_s22, 6144  ;;  %p3131_p4 = scmp.lt.s32.totalorder %s24_s22, %s24_s22 }
   0x8   :  { %p3127_p3 = scmp.ne.s32.totalorder %s24_s22, %s3126_s30  ;;  %p3132_p5 = scmp.lt.s32.totalorder %s3126_s30, %s3126_s30 }
   0xa   :  { %p3133_p6 = por %p3132_p5, %p3131_p4 }
   0xc   :  { %p3134_p7 = pnand %p3133_p6, %p3127_p3 }
   0xe   :  { %3137 = shalt.err (!%p3134_p7)
}
   0xf   :  { %s3141_s7 = smov 384   ;;  %s3142_s8 = smov 24  }
  0x10   :  { %29 = dma.hbm_to_vmem [thread:$0]  %s3743_s3, 6144, %s24_s22, [#allocation4], %s3141_s7, %s3141_s7, %s3142_s8  }
  0x11   :  { %3138 = dma.done.wait [#allocation4], 6144  }
  0x12   :  { %3139 = vsyncadd [#allocation4], 4294961152  ;;  %v3143_v0 = vmov 0.0   ;;  %v45_v1 = vld [vmem:[%s3742_s2] sm:$0xff]  ;;  %vm92_vm0 = vcmask 1043456   ;;  %vm67_vm1 = vcmask 31744  }
  0x13   :  { %163 = vmatprep.mubr.f32.mxu0 %v3143_v0  ;;  %v37_v2 = vld [vmem:[%s3740_s0] sm:$0xff]  ;;  %v353_v3 = vld [vmem:[#allocation3 + $0x8] sm:$0xff]  ;;  %v66_v4 = vcombine.high %v45_v1, %v45_v1  ;;  %v355_v7 = vld [vmem:[#allocation3 + $0x18] sm:$0xff]  ;;  %v3144_v34 = vmov 0.0|0.0   ;;  %vm3145_vm2 = vmmov 0  }
  0x14   :  { %v356_v5 = vld [vmem:[#allocation3 + $0x20] sm:$0xff]  ;;  %2257 = vmatprep.mubr.msk.f32.mxu1 %vm67_vm1, %v37_v2  ;;  %v359_v10 = vld [vmem:[#allocation3 + $0x38] sm:$0xff]  ;;  %v362_v11 = vld [vmem:[#allocation3 + $0x50] sm:$0xff] }
  0x15   :  { %v352_v6 = vld [vmem:[#allocation3] sm:$0xff]  ;;  %v3201_v8 = vpack.c.bf16 %v356_v5, %v353_v3  ;;  %2074 = vmatprep.subr.msk.mxu0 %vm92_vm0, %v66_v4  ;;  %v3206_v12 = vpack.c.bf16 %v362_v11, %v359_v10  ;;  %v358_v13 = vld [vmem:[#allocation3 + $0x30] sm:$0xff]  ;;  %v361_v14 = vld [vmem:[#allocation3 + $0x48] sm:$0xff] }
  0x16   :  { %v3203_v9 = vpack.c.bf16 %v355_v7, %v352_v6  ;;  %2075 = vmatpush1.msk.msra.mxu0 %vm92_vm0, %v45_v1  ;;  %v365_v15 = vld [vmem:[#allocation3 + $0x68] sm:$0xff]  ;;  %v368_v16 = vld [vmem:[#allocation3 + $0x80] sm:$0xff]  ;;  %v3216_v18 = vpack.c.bf16 %v361_v14, %v358_v13  ;;  %v367_v21 = vld [vmem:[#allocation3 + $0x78] sm:$0xff] }
  0x17   :  { %2076 = vmatmul.mubr.msk.f32.vlgmr.msra.gmra.mrb[0].mxu0 %vm67_vm1, %v37_v2  ;;  %2550 = vmatprep.subr.bf16.mxu0 %v3201_v8  ;;  %v38_v17 = vld [vmem:[%s3740_s0 + $0x8] sm:$0xff]  ;;  %v3219_v19 = vpack.c.bf16 %v368_v16, %v365_v15  ;;  %v364_v20 = vld [vmem:[#allocation3 + $0x60] sm:$0xff]  ;;  %v371_v22 = vld [vmem:[#allocation3 + $0x98] sm:$0xff] }
  0x18   :  { %2552 = vmatpush1.bf16.msra.mxu0 %v3203_v9  ;;  %169 = vmatprep.mubr.f32.mxu0 %v3143_v0  ;;  %v374_v23 = vld [vmem:[#allocation3 + $0xb0] sm:$0xff]  ;;  %v3227_v25 = vpack.c.bf16 %v367_v21, %v364_v20  ;;  %v46_v26 = vld [vmem:[%s3742_s2 + $0x8] sm:$0xf]  ;;  %v380_v31 = vld [vmem:[#allocation3 + $0xe0] sm:$0xff] }
  0x19   :  { %2554 = vmatprep.subr.bf16.mxu0 %v3206_v12  ;;  %v39_v24 = vld [vmem:[%s3740_s0 + $0x10] sm:$0xff]  ;;  %v3233_v27 = vpack.c.bf16 %v374_v23, %v371_v22  ;;  %v373_v29 = vld [vmem:[#allocation3 + $0xa8] sm:$0xff]  ;;  %2255 = vmatprep.subr.msk.mxu1 %vm92_vm0, %v46_v26  ;;  %v40_v36 = vld [vmem:[%s3740_s0 + $0x18] sm:$0xff] }
  0x1a   :  { %v370_v28 = vld [vmem:[#allocation3 + $0x90] sm:$0xff]  ;;  %v377_v30 = vld [vmem:[#allocation3 + $0xc8] sm:$0xff]  ;;  %2256 = vmatpush3.msk.msra.mxu1 %vm92_vm0, %v46_v26  ;;  %v360_v38 = vld [vmem:[#allocation3 + $0x40] sm:$0xff] }
  0x1b   :  { %2077 = vmatmul.mubr.msk.f32.gmra.mrb[2].mxu0 %vm67_vm1, %v38_v17  ;;  %v354_v32 = vld [vmem:[#allocation3 + $0x10] sm:$0xff]  ;;  %v357_v33 = vld [vmem:[#allocation3 + $0x28] sm:$0xff]  ;;  %2581 = vmatprep.subr.bf16.mxu1 %v3144_v34  ;;  %v3246_v37 = vpack.c.bf16 %v373_v29, %v370_v28  ;;  %v3249_v39 = vpack.c.bf16 %v380_v31, %v377_v30  ;;  %v376_v40 = vld [vmem:[#allocation3 + $0xc0] sm:$0xff]  ;;  %v49_v30 = vlaneseq }
  0x1c   :  { %2556 = vmatpush1.bf16.msra.mxu0 %v3216_v18  ;;  %175 = vmatprep.mubr.f32.mxu0 %v3143_v0  ;;  %v3239_v35 = vpack.c.bf16 %v357_v33, %v354_v32  ;;  %v379_v41 = vld [vmem:[#allocation3 + $0xd8] sm:$0xff]  ;;  %v386_v44 = vld [vmem:[#allocation3 + $0x110] sm:$0xff]  ;;  %v369_v47 = vld [vmem:[#allocation3 + $0x88] sm:$0xff] }
  0x1d   :  { %2558 = vmatprep.subr.bf16.mxu0 %v3219_v19  ;;  %2258 = vmatmul.mubr.msk.f32.vlgmr.msra.gmra.mrb[0].mxu1 %vm67_vm1, %v38_v17  ;;  %v363_v42 = vld [vmem:[#allocation3 + $0x58] sm:$0xff]  ;;  %v366_v46 = vld [vmem:[#allocation3 + $0x70] sm:$0xff]  ;;  %v41_v48 = vld [vmem:[%s3740_s0 + $0x20] sm:$0xff]  ;;  %v3263_v49 = vpack.c.bf16 %v379_v41, %v376_v40  ;;  %v50_v31 = vshrl.u32 %v49_v30, 7 }
  0x1e   :  { %v383_v43 = vld [vmem:[#allocation3 + $0xf8] sm:$0xff]  ;;  %2583 = vmatpush3.bf16.msra.mxu1 %v3239_v35  ;;  %v3253_v45 = vpack.c.bf16 %v363_v42, %v360_v38  ;;  %2260 = vmatprep.mubr.msk.f32.mxu1 %vm67_vm1, %v39_v24  ;;  %v382_v51 = vld [vmem:[#allocation3 + $0xf0] sm:$0xff]  ;;  %v385_v52 = vld [vmem:[#allocation3 + $0x108] sm:$0xff]  ;;  %v3270_v55 = vpack.c.bf16 %v369_v47, %v366_v46 }
  0x1f   :  { %2078 = vmatmul.mubr.msk.f32.gmra.mrb[4].mxu0 %vm67_vm1, %v39_v24  ;;  %2584 = vmatprep.subr.bf16.mxu1 %v3144_v34  ;;  %v3266_v50 = vpack.c.bf16 %v386_v44, %v383_v43  ;;  %v389_v53 = vld [vmem:[#allocation3 + $0x128] sm:$0xff]  ;;  %v392_v54 = vld [vmem:[#allocation3 + $0x140] sm:$0xff]  ;;  %v375_v57 = vld [vmem:[#allocation3 + $0xb8] sm:$0xff]  ;;  %v3280_v59 = vpack.c.bf16 %v385_v52, %v382_v51  ;;  %v59_v32 = vsub.s32 2, %v50_v31 }
  0x20   :  { %2560 = vmatpush1.bf16.msra.mxu0 %v3227_v25  ;;  %181 = vmatprep.mubr.f32.mxu0 %v3143_v0  ;;  %v372_v56 = vld [vmem:[#allocation3 + $0xa0] sm:$0xff]  ;;  %v42_v58 = vld [vmem:[%s3740_s0 + $0x28] sm:$0xff]  ;;  %v43_v60 = vld [vmem:[%s3740_s0 + $0x30] sm:$0xff]  ;;  %v3286_v61 = vpack.c.bf16 %v392_v54, %v389_v53 }
  0x21   :  { %2562 = vmatprep.subr.bf16.mxu0 %v3233_v27  ;;  %2261 = vmatmul.mubr.msk.f32.gmra.mrb[2].mxu1 %vm67_vm1, %v40_v36  ;;  %v388_v62 = vld [vmem:[#allocation3 + $0x120] sm:$0xff]  ;;  %v391_v63 = vld [vmem:[#allocation3 + $0x138] sm:$0xff]  ;;  %v398_v2 = vld [vmem:[#allocation3 + $0x170] sm:$0xff]  ;;  %v3290_v3 = vpack.c.bf16 %v375_v57, %v372_v56 }
  0x22   :  { %2586 = vmatpush3.bf16.msra.mxu1 %v3253_v45  ;;  %2263 = vmatprep.mubr.msk.f32.mxu1 %vm67_vm1, %v41_v48  ;;  %v395_v1 = vld [vmem:[#allocation3 + $0x158] sm:$0xff]  ;;  %v378_v4 = vld [vmem:[#allocation3 + $0xd0] sm:$0xff]  ;;  %v381_v5 = vld [vmem:[#allocation3 + $0xe8] sm:$0xff]  ;;  %v3297_v6 = vpack.c.bf16 %v391_v63, %v388_v62 }
  0x23   :  { %2079 = vmatmul.mubr.msk.f32.gmra.mrb[6].mxu0 %vm67_vm1, %v40_v36  ;;  %2587 = vmatprep.subr.bf16.mxu1 %v3144_v34  ;;  %v44_v7 = vld [vmem:[%s3740_s0 + $0x38] sm:$0xff]  ;;  %v3303_v10 = vpack.c.bf16 %v398_v2, %v395_v1  ;;  %v394_v11 = vld [vmem:[#allocation3 + $0x150] sm:$0xff]  ;;  %v397_v13 = vld [vmem:[#allocation3 + $0x168] sm:$0xff]  ;;  %v3307_v14 = vpack.c.bf16 %v381_v5, %v378_v4 }
  0x24   :  { %2564 = vmatpush1.bf16.msra.mxu0 %v3246_v37  ;;  %187 = vmatprep.mubr.f32.mxu0 %v3143_v0  ;;  %v384_v15 = vld [vmem:[#allocation3 + $0x100] sm:$0xff]  ;;  %v387_v16 = vld [vmem:[#allocation3 + $0x118] sm:$0xff]  ;;  %v3315_v17 = vpack.c.bf16 %v397_v13, %v394_v11  ;;  %v390_v21 = vld [vmem:[#allocation3 + $0x130] sm:$0xff] }
  0x25   :  { %2566 = vmatprep.subr.bf16.mxu0 %v3249_v39  ;;  %2264 = vmatmul.mubr.msk.f32.gmra.mrb[4].mxu1 %vm67_vm1, %v42_v58  ;;  %v3319_v20 = vpack.c.bf16 %v387_v16, %v384_v15  ;;  %v393_v22 = vld [vmem:[#allocation3 + $0x148] sm:$0xff]  ;;  %v3328_v23 = vld [vmem:[%s3741_s1] sm:$0xff]  ;;  %v399_v28 = vld [vmem:[#allocation3 + $0x178] sm:$0xff] }
  0x26   :  { %2589 = vmatpush3.bf16.msra.mxu1 %v3270_v55  ;;  %2266 = vmatprep.mubr.msk.f32.mxu1 %vm67_vm1, %v43_v60  ;;  %v3332_v24 = vpack.c.bf16 %v393_v22, %v390_v21  ;;  %v396_v26 = vld [vmem:[#allocation3 + $0x160] sm:$0xff] }
  0x27   :  { %2080 = vmatmul.mubr.msk.f32.gmra.mrb[8].mxu0 %vm67_vm1, %v41_v48  ;;  %2590 = vmatprep.subr.bf16.mxu1 %v3144_v34  ;;  %v3340_v29 = vpack.c.bf16 %v399_v28, %v396_v26  ;;  %v47_v33 = vld [vmem:[%s3744_s4] sm:$0x7] }
  0x28   :  { %2568 = vmatpush1.bf16.msra.mxu0 %v3263_v49  ;;  %193 = vmatprep.mubr.f32.mxu0 %v3143_v0  ;;  %v60_v36 = vrot.slane %v47_v33, %v59_v32  ;;  %v3404_v26 = vld [vmem:[%s3745_s5] ss:$0 sm:$0xff] }
  0x29   :  { %2570 = vmatprep.subr.bf16.mxu0 %v3266_v50  ;;  %2267 = vmatmul.mubr.msk.f32.gmra.mrb[6].mxu1 %vm67_vm1, %v44_v7 }
  0x2a   :  { %2592 = vmatpush3.bf16.msra.mxu1 %v3290_v3  ;;  %2301 = vmatprep.mubr.msk.f32.mxu1 %vm3145_vm2, %v3143_v0 }
  0x2b   :  { %2081 = vmatmul.mubr.msk.f32.gmra.mrb[10].mxu0 %vm67_vm1, %v42_v58  ;;  %2593 = vmatprep.subr.bf16.mxu1 %v3144_v34  ;;  %v51_v58 = vsub.s32 0, %v50_v31 }
  0x2c   :  { %2572 = vmatpush1.bf16.msra.mxu0 %v3280_v59  ;;  %199 = vmatprep.mubr.f32.mxu0 %v3143_v0 }
  0x2d   :  { %2574 = vmatprep.subr.bf16.mxu0 %v3286_v61  ;;  %v3395_v62 = vrot.slane %v47_v33, %v51_v58 }
  0x2e   :  { %2595 = vmatpush3.bf16.msra.mxu1 %v3307_v14 }
  0x2f   :  { %2082 = vmatmul.mubr.msk.f32.gmra.mrb[12].mxu0 %vm67_vm1, %v43_v60  ;;  %2596 = vmatprep.subr.bf16.mxu1 %v3144_v34  ;;  %v55_v60 = vsub.s32 1, %v50_v31 }
  0x30   :  { %2576 = vmatpush1.bf16.msra.mxu0 %v3297_v6  ;;  %205 = vmatprep.mubr.f32.mxu0 %v3143_v0 }
  0x31   :  { %2578 = vmatprep.subr.bf16.mxu0 %v3303_v10  ;;  %v3397_v1 = vrot.slane %v47_v33, %v55_v60 }
  0x32   :  { %2598 = vmatpush3.bf16.msra.mxu1 %v3319_v20 }
  0x33   :  { %2083 = vmatmul.mubr.msk.f32.gmra.mrb[14].mxu0 %vm67_vm1, %v44_v7  ;;  %2599 = vmatprep.subr.bf16.mxu1 %v3144_v34 }
  0x34   :  { %2580 = vmatpush1.bf16.msra.mxu0 %v3315_v17  ;;  %464 = vmatprep.mubr.f32.mxu0 %v3143_v0 }
  0x35   :  { %2606 = vmatprep.subr.bf16.mxu0 %v3201_v8 }
  0x36   :  { %2601 = vmatpush3.bf16.msra.mxu1 %v3332_v24 }
  0x37   :  { %465 = vmatmul.mubr.f32.vlgmr.msra.gmra.mrb[0].mxu0 %v3328_v23  ;;  %2602 = vmatprep.subr.bf16.mxu1 %v3144_v34 }
  0x38   :  { %2608 = vmatpush1.bf16.msra.mxu0 %v3203_v9  ;;  %679 = vmatprep.mubr.f32.mxu0 %v3143_v0 }
  0x39   :  { %2610 = vmatprep.subr.bf16.mxu0 %v3206_v12 }
  0x3a   :  { %2604 = vmatpush3.bf16.msra.mxu1 %v3340_v29 }
  0x3b   :  { %2637 = vmatprep.subr.bf16.mxu1 %v3144_v34 }
  0x3c   :  { %2612 = vmatpush1.bf16.msra.mxu0 %v3216_v18 }
  0x3d   :  { %2614 = vmatprep.subr.bf16.mxu0 %v3219_v19  ;;  %2302 = vmatmul.mubr.f32.vlgmr.msra.gmra.mrb[8].mxu1 %v3328_v23 }
  0x3e   :  { %2639 = vmatpush3.bf16.msra.mxu1 %v3239_v35  ;;  %2336 = vmatprep.mubr.msk.f32.mxu1 %vm3145_vm2, %v3143_v0 }
  0x3f   :  { %2640 = vmatprep.subr.bf16.mxu1 %v3144_v34 }
  0x40   :  { %2616 = vmatpush1.bf16.msra.mxu0 %v3227_v25 }
  0x41   :  { %2618 = vmatprep.subr.bf16.mxu0 %v3233_v27 }
  0x42   :  { %2642 = vmatpush3.bf16.msra.mxu1 %v3253_v45 }
  0x43   :  { %2643 = vmatprep.subr.bf16.mxu1 %v3144_v34 }
  0x44   :  { %2620 = vmatpush1.bf16.msra.mxu0 %v3246_v37 }
  0x45   :  { %2622 = vmatprep.subr.bf16.mxu0 %v3249_v39 }
  0x46   :  { %2645 = vmatpush3.bf16.msra.mxu1 %v3270_v55 }
  0x47   :  { %2646 = vmatprep.subr.bf16.mxu1 %v3144_v34 }
  0x48   :  { %2624 = vmatpush1.bf16.msra.mxu0 %v3263_v49 }
  0x49   :  { %2626 = vmatprep.subr.bf16.mxu0 %v3266_v50 }
  0x4a   :  { %2648 = vmatpush3.bf16.msra.mxu1 %v3290_v3 }
  0x4b   :  { %2649 = vmatprep.subr.bf16.mxu1 %v3144_v34 }
  0x4c   :  { %2628 = vmatpush1.bf16.msra.mxu0 %v3280_v59 }
  0x4d   :  { %2630 = vmatprep.subr.bf16.mxu0 %v3286_v61 }
  0x4e   :  { %2651 = vmatpush3.bf16.msra.mxu1 %v3307_v14 }
  0x4f   :  { %2652 = vmatprep.subr.bf16.mxu1 %v3144_v34 }
  0x50   :  { %2632 = vmatpush1.bf16.msra.mxu0 %v3297_v6 }
  0x51   :  { %2634 = vmatprep.subr.bf16.mxu0 %v3303_v10 }
  0x52   :  { %2654 = vmatpush3.bf16.msra.mxu1 %v3319_v20 }
  0x53   :  { %2655 = vmatprep.subr.bf16.mxu1 %v3144_v34 }
  0x54   :  { %2636 = vmatpush1.bf16.msra.mxu0 %v3315_v17 }
  0x55   :  { %2662 = vmatprep.subr.bf16.mxu0 %v3201_v8 }
  0x56   :  { %2657 = vmatpush3.bf16.msra.mxu1 %v3332_v24 }
  0x57   :  { %2658 = vmatprep.subr.bf16.mxu1 %v3144_v34 }
  0x5a   :  { %2660 = vmatpush3.bf16.msra.mxu1 %v3340_v29 }
  0x5b   :  { %2693 = vmatprep.subr.bf16.mxu1 %v3144_v34 }
  0xf0   :  { %v2259_v38 = vpop.f32.mrb[0].mxu1 }
  0xf1   :  { %v3381_v40 = vadd.f32 %v2259_v38, %v60_v36  ;;  %v278_v41 = vpop.f32.mrb[1].mxu1 }
  0xf2   :  { %v279_v32 = vadd.f32 %v278_v41, %v60_v36 }
  0xf4   :  { %v2262_v42 = vpop.f32.mrb[2].mxu1 }
  0xf5   :  { %v3383_v43 = vadd.f32 %v2262_v42, %v60_v36  ;;  %v288_v44 = vpop.f32.mrb[3].mxu1 }
  0xf6   :  { %v3385_v46 = vadd.f32 %v288_v44, %v60_v36 }
  0xf8   :  { %v2265_v47 = vpop.f32.mrb[4].mxu1 }
  0xf9   :  { %v3387_v48 = vadd.f32 %v2265_v47, %v60_v36  ;;  %v298_v51 = vpop.f32.mrb[5].mxu1 }
  0xfa   :  { %v3389_v52 = vadd.f32 %v298_v51, %v60_v36 }
  0xfc   :  { %v2268_v53 = vpop.f32.mrb[6].mxu1 }
  0xfd   :  { %v3391_v54 = vadd.f32 %v2268_v53, %v60_v36  ;;  %v308_v56 = vpop.f32.mrb[7].mxu1 }
  0xfe   :  { %v3393_v57 = vadd.f32 %v308_v56, %v60_v36 }
 0x10a   :  { %v466_v63 = vpop.f32.mrb[0].mxu0 }
 0x10b   :  { %v2997_v2 = vadd.f32 %v466_v63, %v3395_v62  ;;  %v468_v4 = vpop.f32.mrb[1].mxu0 }
 0x10c   :  { %v2998_v7 = vadd.f32 %v468_v4, %v3397_v1 }
 0x10d   :  { %v2094_v5 = vmul.f32 -1.442695, %v2997_v2 }
 0x10e   :  { %v2095_v11 = vmul.f32 -1.442695, %v2998_v7 }
 0x10f   :  { %3036 = vpow2.f32 %v2094_v5 }
 0x110   :  { %v537_v13 = vpop.f32.mrb[8].mxu1  ;;  %3038 = vpow2.f32 %v2095_v11 }
 0x111   :  { %v2303_v15 = vpop.f32.mrb[9].mxu1  ;;  %v555_v30 = vadd.f32 %v3404_v26, %v537_v13 }
 0x119   :  { %v3037_v16 = vpop.eup %3036 }
 0x11a   :  { %v545_v21 = vadd.f32 1.0, %v3037_v16  ;;  %v3039_v22 = vpop.eup %3038 }
 0x11b   :  { %v552_v28 = vadd.f32 1.0, %v3039_v22 }
 0x11c   :  { %3040 = vrcp.f32 %v545_v21 }
 0x11d   :  { %3042 = vrcp.f32 %v552_v28 }
 0x126   :  { %v3041_v31 = vpop.eup %3040 }
 0x127   :  { %v556_v33 = vmul.f32 %v3041_v31, %v555_v30  ;;  %v3043_v42 = vpop.eup %3042 }
 0x128   :  { %v559_v44 = vsub.f32 1.0, %v3043_v42  ;;  %v561_v53 = vmul.f32 %v3043_v42, %v3328_v23  ;;  %v1216_v42 = vld [vmem:[#allocation3 + $0x20] sm:$0xff] }
 0x129   :  { %v557_v38 = vadd.f32 %v556_v33, %v279_v32 }
 0x12b   :  { %3044 = vtanh.f32 %v557_v38 }
 0x135   :  { %v3045_v47 = vpop.eup %3044 }
 0x136   :  { %v560_v51 = vmul.f32 %v3045_v47, %v559_v44  ;;  %v1215_v47 = vld [vmem:[#allocation3 + $0x18] sm:$0xff] }
 0x138   :  { %v3408_v56 = vadd.f32 %v561_v53, %v560_v51  ;;  %v1219_v53 = vld [vmem:[#allocation3 + $0x38] sm:$0xff] }
 0x13a   :  { %563 = vst [vmem:[%s3746_s6] sm:$0xff] %v3408_v56  ;;  %680 = vmatmul.mubr.f32.vlgmr.msra.gmra.mrb[2].mxu0 %v3408_v56  ;;  %2337 = vmatmul.mubr.f32.vlgmr.msra.gmra.mrb[10].mxu1 %v3408_v56 }
 0x13b   :  { %2664 = vmatpush1.bf16.msra.mxu0 %v3203_v9  ;;  %2695 = vmatpush3.bf16.msra.mxu1 %v3239_v35 }
 0x13c   :  { %2666 = vmatprep.subr.bf16.mxu0 %v3206_v12  ;;  %2696 = vmatprep.subr.bf16.mxu1 %v3144_v34 }
 0x13d   :  { %894 = vmatprep.mubr.f32.mxu0 %v3143_v0  ;;  %2371 = vmatprep.mubr.msk.f32.mxu1 %vm3145_vm2, %v3143_v0 }
 0x13f   :  { %2668 = vmatpush1.bf16.msra.mxu0 %v3216_v18  ;;  %2698 = vmatpush3.bf16.msra.mxu1 %v3253_v45 }
 0x140   :  { %2670 = vmatprep.subr.bf16.mxu0 %v3219_v19  ;;  %2699 = vmatprep.subr.bf16.mxu1 %v3144_v34 }
 0x143   :  { %2672 = vmatpush1.bf16.msra.mxu0 %v3227_v25  ;;  %2701 = vmatpush3.bf16.msra.mxu1 %v3270_v55 }
 0x144   :  { %2674 = vmatprep.subr.bf16.mxu0 %v3233_v27  ;;  %2702 = vmatprep.subr.bf16.mxu1 %v3144_v34 }
 0x147   :  { %2676 = vmatpush1.bf16.msra.mxu0 %v3246_v37  ;;  %2704 = vmatpush3.bf16.msra.mxu1 %v3290_v3 }
 0x148   :  { %2678 = vmatprep.subr.bf16.mxu0 %v3249_v39  ;;  %2705 = vmatprep.subr.bf16.mxu1 %v3144_v34 }
 0x14b   :  { %2680 = vmatpush1.bf16.msra.mxu0 %v3263_v49  ;;  %2707 = vmatpush3.bf16.msra.mxu1 %v3307_v14 }
 0x14c   :  { %2682 = vmatprep.subr.bf16.mxu0 %v3266_v50  ;;  %2708 = vmatprep.subr.bf16.mxu1 %v3144_v34 }
 0x14f   :  { %2684 = vmatpush1.bf16.msra.mxu0 %v3280_v59  ;;  %2710 = vmatpush3.bf16.msra.mxu1 %v3319_v20 }
 0x150   :  { %2686 = vmatprep.subr.bf16.mxu0 %v3286_v61  ;;  %2711 = vmatprep.subr.bf16.mxu1 %v3144_v34 }
 0x153   :  { %2688 = vmatpush1.bf16.msra.mxu0 %v3297_v6  ;;  %2713 = vmatpush3.bf16.msra.mxu1 %v3332_v24 }
 0x154   :  { %2690 = vmatprep.subr.bf16.mxu0 %v3303_v10  ;;  %2714 = vmatprep.subr.bf16.mxu1 %v3144_v34 }
 0x157   :  { %2692 = vmatpush1.bf16.msra.mxu0 %v3315_v17  ;;  %2716 = vmatpush3.bf16.msra.mxu1 %v3340_v29 }
 0x158   :  { %2718 = vmatprep.subr.bf16.mxu0 %v3201_v8  ;;  %2749 = vmatprep.subr.bf16.mxu1 %v3144_v34 }
 0x20d   :  { %v681_v23 = vpop.f32.mrb[2].mxu0  ;;  %v752_v36 = vpop.f32.mrb[10].mxu1 }
 0x20e   :  { %v2999_v41 = vadd.f32 %v681_v23, %v3395_v62  ;;  %v683_v58 = vpop.f32.mrb[3].mxu0  ;;  %v2338_v60 = vpop.f32.mrb[11].mxu1  ;;  %v770_v8 = vadd.f32 %v3404_v26, %v752_v36  ;;  %v1218_v23 = vld [vmem:[#allocation3 + $0x30] sm:$0xff] }
 0x20f   :  { %v3000_v2 = vadd.f32 %v683_v58, %v3397_v1  ;;  %v1228_v58 = vld [vmem:[#allocation3 + $0x80] sm:$0xff] }
 0x210   :  { %v2096_v63 = vmul.f32 -1.442695, %v2999_v41  ;;  %v1225_v41 = vld [vmem:[#allocation3 + $0x68] sm:$0xff] }
 0x211   :  { %v2097_v4 = vmul.f32 -1.442695, %v3000_v2  ;;  %v3526_v60 = vpack.c.bf16 %v1228_v58, %v1225_v41  ;;  %v1227_v2 = vld [vmem:[#allocation3 + $0x78] sm:$0xff] }
 0x212   :  { %3046 = vpow2.f32 %v2096_v63  ;;  %v1224_v63 = vld [vmem:[#allocation3 + $0x60] sm:$0xff] }
 0x213   :  { %3048 = vpow2.f32 %v2097_v4  ;;  %v3528_v4 = vpack.c.bf16 %v1227_v2, %v1224_v63 }
 0x21c   :  { %v3047_v5 = vpop.eup %3046 }
 0x21d   :  { %v760_v7 = vadd.f32 1.0, %v3047_v5  ;;  %v3049_v11 = vpop.eup %3048  ;;  %v1231_v5 = vld [vmem:[#allocation3 + $0x98] sm:$0xff] }
 0x21e   :  { %v767_v13 = vadd.f32 1.0, %v3049_v11 }
 0x21f   :  { %3050 = vrcp.f32 %v760_v7  ;;  %v1234_v7 = vld [vmem:[#allocation3 + $0xb0] sm:$0xff] }
 0x220   :  { %3052 = vrcp.f32 %v767_v13  ;;  %v3532_v11 = vpack.c.bf16 %v1234_v7, %v1231_v5  ;;  %v1230_v13 = vld [vmem:[#allocation3 + $0x90] sm:$0xff] }
 0x229   :  { %v3051_v15 = vpop.eup %3050 }
 0x22a   :  { %v771_v16 = vmul.f32 %v3051_v15, %v770_v8  ;;  %v3053_v22 = vpop.eup %3052  ;;  %v1233_v8 = vld [vmem:[#allocation3 + $0xa8] sm:$0xff]  ;;  %v1232_v15 = vld [vmem:[#allocation3 + $0xa0] sm:$0xff] }
 0x22b   :  { %v774_v28 = vsub.f32 1.0, %v3053_v22  ;;  %v776_v32 = vmul.f32 %v3053_v22, %v3408_v56 }
 0x22c   :  { %v772_v21 = vadd.f32 %v771_v16, %v3381_v40  ;;  %v3534_v16 = vpack.c.bf16 %v1233_v8, %v1230_v13 }
 0x22e   :  { %3054 = vtanh.f32 %v772_v21  ;;  %v1235_v21 = vld [vmem:[#allocation3 + $0xb8] sm:$0xff] }
 0x22f   :  { %v3537_v22 = vpack.c.bf16 %v1235_v21, %v1232_v15 }
 0x238   :  { %v3055_v30 = vpop.eup %3054 }
 0x239   :  { %v775_v31 = vmul.f32 %v3055_v30, %v774_v28  ;;  %v1237_v28 = vld [vmem:[#allocation3 + $0xc8] sm:$0xff]  ;;  %v1240_v30 = vld [vmem:[#allocation3 + $0xe0] sm:$0xff] }
 0x23b   :  { %v777_v33 = vadd.f32 %v776_v32, %v775_v31  ;;  %v3541_v31 = vpack.c.bf16 %v1240_v30, %v1237_v28  ;;  %v1236_v32 = vld [vmem:[#allocation3 + $0xc0] sm:$0xff] }
 0x23d   :  { %778 = vst [vmem:[%s3746_s6 + $0x8] sm:$0xff] %v777_v33  ;;  %895 = vmatmul.mubr.f32.vlgmr.msra.gmra.mrb[4].mxu0 %v777_v33  ;;  %2372 = vmatmul.mubr.f32.vlgmr.msra.gmra.mrb[12].mxu1 %v777_v33 }
 0x23e   :  { %2720 = vmatpush1.bf16.msra.mxu0 %v3203_v9  ;;  %2751 = vmatpush3.bf16.msra.mxu1 %v3239_v35 }
 0x23f   :  { %2722 = vmatprep.subr.bf16.mxu0 %v3206_v12  ;;  %2752 = vmatprep.subr.bf16.mxu1 %v3144_v34 }
 0x240   :  { %1109 = vmatprep.mubr.f32.mxu0 %v3143_v0  ;;  %2406 = vmatprep.mubr.msk.f32.mxu1 %vm3145_vm2, %v3143_v0 }
 0x242   :  { %2724 = vmatpush1.bf16.msra.mxu0 %v3216_v18  ;;  %2754 = vmatpush3.bf16.msra.mxu1 %v3253_v45 }
 0x243   :  { %2726 = vmatprep.subr.bf16.mxu0 %v3219_v19  ;;  %2755 = vmatprep.subr.bf16.mxu1 %v3144_v34 }
 0x246   :  { %2728 = vmatpush1.bf16.msra.mxu0 %v3227_v25  ;;  %2757 = vmatpush3.bf16.msra.mxu1 %v3270_v55 }
 0x247   :  { %2730 = vmatprep.subr.bf16.mxu0 %v3233_v27  ;;  %2758 = vmatprep.subr.bf16.mxu1 %v3144_v34 }
 0x24a   :  { %2732 = vmatpush1.bf16.msra.mxu0 %v3246_v37  ;;  %2760 = vmatpush3.bf16.msra.mxu1 %v3290_v3 }
 0x24b   :  { %2734 = vmatprep.subr.bf16.mxu0 %v3249_v39  ;;  %2761 = vmatprep.subr.bf16.mxu1 %v3144_v34 }
 0x24e   :  { %2736 = vmatpush1.bf16.msra.mxu0 %v3263_v49  ;;  %2763 = vmatpush3.bf16.msra.mxu1 %v3307_v14 }
 0x24f   :  { %2738 = vmatprep.subr.bf16.mxu0 %v3266_v50  ;;  %2764 = vmatprep.subr.bf16.mxu1 %v3144_v34 }
 0x252   :  { %2740 = vmatpush1.bf16.msra.mxu0 %v3280_v59  ;;  %2766 = vmatpush3.bf16.msra.mxu1 %v3319_v20 }
 0x253   :  { %2742 = vmatprep.subr.bf16.mxu0 %v3286_v61  ;;  %2767 = vmatprep.subr.bf16.mxu1 %v3144_v34 }
 0x256   :  { %2744 = vmatpush1.bf16.msra.mxu0 %v3297_v6  ;;  %2769 = vmatpush3.bf16.msra.mxu1 %v3332_v24 }
 0x257   :  { %2746 = vmatprep.subr.bf16.mxu0 %v3303_v10  ;;  %2770 = vmatprep.subr.bf16.mxu1 %v3144_v34 }
 0x25a   :  { %2748 = vmatpush1.bf16.msra.mxu0 %v3315_v17  ;;  %2772 = vmatpush3.bf16.msra.mxu1 %v3340_v29 }
 0x25b   :  { %2805 = vmatprep.subr.bf16.mxu1 %v3144_v34 }
 0x310   :  { %v896_v9 = vpop.f32.mrb[4].mxu0  ;;  %v967_v12 = vpop.f32.mrb[12].mxu1 }
 0x311   :  { %v3001_v18 = vadd.f32 %v896_v9, %v3395_v62  ;;  %v898_v19 = vpop.f32.mrb[5].mxu0  ;;  %v2373_v25 = vpop.f32.mrb[13].mxu1  ;;  %v985_v3 = vadd.f32 %v3404_v26, %v967_v12  ;;  %v1238_v9 = vld [vmem:[#allocation3 + $0xd0] sm:$0xff] }
 0x312   :  { %v3002_v37 = vadd.f32 %v898_v19, %v3397_v1  ;;  %v1243_v25 = vld [vmem:[#allocation3 + $0xf8] sm:$0xff] }
 0x313   :  { %v2098_v27 = vmul.f32 -1.442695, %v3001_v18  ;;  %v1241_v18 = vld [vmem:[#allocation3 + $0xe8] sm:$0xff] }
 0x314   :  { %v2099_v39 = vmul.f32 -1.442695, %v3002_v37  ;;  %v3547_v19 = vpack.c.bf16 %v1241_v18, %v1238_v9  ;;  %v1242_v37 = vld [vmem:[#allocation3 + $0xf0] sm:$0xff] }
 0x315   :  { %3056 = vpow2.f32 %v2098_v27  ;;  %v1246_v27 = vld [vmem:[#allocation3 + $0x110] sm:$0xff] }
 0x316   :  { %3058 = vpow2.f32 %v2099_v39  ;;  %v3551_v39 = vpack.c.bf16 %v1246_v27, %v1243_v25 }
 0x31f   :  { %v3057_v49 = vpop.eup %3056 }
 0x320   :  { %v975_v50 = vadd.f32 1.0, %v3057_v49  ;;  %v3059_v59 = vpop.eup %3058  ;;  %v1245_v49 = vld [vmem:[#allocation3 + $0x108] sm:$0xff] }
 0x321   :  { %v982_v61 = vadd.f32 1.0, %v3059_v59  ;;  %v1247_v59 = vld [vmem:[#allocation3 + $0x118] sm:$0xff] }
 0x322   :  { %3060 = vrcp.f32 %v975_v50  ;;  %v1244_v50 = vld [vmem:[#allocation3 + $0x100] sm:$0xff] }
 0x323   :  { %3062 = vrcp.f32 %v982_v61  ;;  %v3554_v61 = vpack.c.bf16 %v1245_v49, %v1242_v37 }
 0x32c   :  { %v3061_v6 = vpop.eup %3060 }
 0x32d   :  { %v986_v10 = vmul.f32 %v3061_v6, %v985_v3  ;;  %v3063_v17 = vpop.eup %3062  ;;  %v3556_v3 = vpack.c.bf16 %v1247_v59, %v1244_v50  ;;  %v1249_v6 = vld [vmem:[#allocation3 + $0x128] sm:$0xff] }
 0x32e   :  { %v989_v20 = vsub.f32 1.0, %v3063_v17  ;;  %v991_v40 = vmul.f32 %v3063_v17, %v777_v33  ;;  %v1239_v33 = vld [vmem:[#allocation3 + $0xd8] sm:$0xff] }
 0x32f   :  { %v987_v14 = vadd.f32 %v986_v10, %v3385_v46  ;;  %v1213_v46 = vld [vmem:[#allocation3 + $0x8] sm:$0xff]  ;;  %v3544_v12 = vpack.c.bf16 %v1239_v33, %v1236_v32  ;;  %v1252_v10 = vld [vmem:[#allocation3 + $0x140] sm:$0xff] }
 0x330   :  { %v3514_v44 = vpack.c.bf16 %v1216_v42, %v1213_v46  ;;  %v3559_v17 = vpack.c.bf16 %v1252_v10, %v1249_v6  ;;  %v1255_v46 = vld [vmem:[#allocation3 + $0x158] sm:$0xff]  ;;  %v1258_v42 = vld [vmem:[#allocation3 + $0x170] sm:$0xff] }
 0x331   :  { %3064 = vtanh.f32 %v987_v14  ;;  %v1248_v14 = vld [vmem:[#allocation3 + $0x120] sm:$0xff] }
 0x332   :  { %2774 = vmatprep.subr.bf16.mxu0 %v3514_v44 }
 0x33b   :  { %v3065_v24 = vpop.eup %3064 }
 0x33c   :  { %v990_v29 = vmul.f32 %v3065_v24, %v989_v20  ;;  %v1251_v20 = vld [vmem:[#allocation3 + $0x138] sm:$0xff]  ;;  %v1250_v24 = vld [vmem:[#allocation3 + $0x130] sm:$0xff] }
 0x33e   :  { %v3497_v38 = vadd.f32 %v991_v40, %v990_v29  ;;  %v1253_v29 = vld [vmem:[#allocation3 + $0x148] sm:$0xff]  ;;  %v3562_v40 = vpack.c.bf16 %v1251_v20, %v1248_v14  ;;  %v1435_v20 = vld [vmem:[#allocation3 + $0x40] sm:$0xff] }
 0x340   :  { %993 = vst [vmem:[%s3746_s6 + $0x10] sm:$0xff] %v3497_v38  ;;  %1110 = vmatmul.mubr.f32.vlgmr.msra.gmra.mrb[6].mxu0 %v3497_v38  ;;  %2407 = vmatmul.mubr.f32.vlgmr.msra.gmra.mrb[14].mxu1 %v3497_v38 }
 0x341   :  { %2807 = vmatpush3.bf16.msra.mxu1 %v3239_v35  ;;  %1324 = vmatprep.mubr.f32.mxu0 %v3143_v0  ;;  %v1212_v35 = vld [vmem:[#allocation3] sm:$0xff] }
 0x342   :  { %2808 = vmatprep.subr.bf16.mxu1 %v3144_v34  ;;  %2441 = vmatprep.mubr.msk.f32.mxu1 %vm3145_vm2, %v3143_v0  ;;  %v3516_v51 = vpack.c.bf16 %v1215_v47, %v1212_v35  ;;  %v3566_v35 = vpack.c.bf16 %v1253_v29, %v1250_v24  ;;  %v3568_v47 = vpack.c.bf16 %v1258_v42, %v1255_v46  ;;  %v1438_v24 = vld [vmem:[#allocation3 + $0x58] sm:$0xff]  ;;  %v1441_v46 = vld [vmem:[#allocation3 + $0x70] sm:$0xff]  ;;  %v1444_v42 = vld [vmem:[#allocation3 + $0x88] sm:$0xff] }
 0x343   :  { %v3619_v29 = vpack.c.bf16 %v1438_v24, %v1435_v20 }
 0x344   :  { %2776 = vmatpush1.bf16.msra.mxu0 %v3516_v51 }
 0x345   :  { %2810 = vmatpush3.bf16.msra.mxu1 %v3253_v45  ;;  %v1222_v45 = vld [vmem:[#allocation3 + $0x50] sm:$0xff] }
 0x346   :  { %2811 = vmatprep.subr.bf16.mxu1 %v3144_v34  ;;  %v3520_v56 = vpack.c.bf16 %v1222_v45, %v1219_v53  ;;  %v1254_v53 = vld [vmem:[#allocation3 + $0x150] sm:$0xff]  ;;  %v1257_v45 = vld [vmem:[#allocation3 + $0x168] sm:$0xff] }
 0x347   :  { %v3572_v41 = vpack.c.bf16 %v1257_v45, %v1254_v53  ;;  %v3623_v53 = vpack.c.bf16 %v1444_v42, %v1441_v46 }
 0x348   :  { %2778 = vmatprep.subr.bf16.mxu0 %v3520_v56 }
 0x349   :  { %2813 = vmatpush3.bf16.msra.mxu1 %v3270_v55  ;;  %v1221_v55 = vld [vmem:[#allocation3 + $0x48] sm:$0xff] }
 0x34a   :  { %2814 = vmatprep.subr.bf16.mxu1 %v3144_v34  ;;  %v3522_v36 = vpack.c.bf16 %v1221_v55, %v1218_v23  ;;  %v1256_v23 = vld [vmem:[#allocation3 + $0x160] sm:$0xff]  ;;  %v1259_v55 = vld [vmem:[#allocation3 + $0x178] sm:$0xff] }
 0x34b   :  { %v3576_v58 = vpack.c.bf16 %v1259_v55, %v1256_v23 }
 0x34c   :  { %2780 = vmatpush1.bf16.msra.mxu0 %v3522_v36 }
 0x34d   :  { %2782 = vmatprep.subr.bf16.mxu0 %v3526_v60  ;;  %2816 = vmatpush3.bf16.msra.mxu1 %v3537_v22 }
 0x34e   :  { %2817 = vmatprep.subr.bf16.mxu1 %v3144_v34 }
 0x350   :  { %2784 = vmatpush1.bf16.msra.mxu0 %v3528_v4 }
 0x351   :  { %2786 = vmatprep.subr.bf16.mxu0 %v3532_v11  ;;  %2819 = vmatpush3.bf16.msra.mxu1 %v3547_v19 }
 0x352   :  { %2820 = vmatprep.subr.bf16.mxu1 %v3144_v34 }
 0x354   :  { %2788 = vmatpush1.bf16.msra.mxu0 %v3534_v16 }
 0x355   :  { %2790 = vmatprep.subr.bf16.mxu0 %v3541_v31  ;;  %2822 = vmatpush3.bf16.msra.mxu1 %v3556_v3 }
 0x356   :  { %2823 = vmatprep.subr.bf16.mxu1 %v3144_v34 }
 0x358   :  { %2792 = vmatpush1.bf16.msra.mxu0 %v3544_v12 }
 0x359   :  { %2794 = vmatprep.subr.bf16.mxu0 %v3551_v39  ;;  %2825 = vmatpush3.bf16.msra.mxu1 %v3566_v35 }
 0x35a   :  { %2826 = vmatprep.subr.bf16.mxu1 %v3144_v34 }
 0x35c   :  { %2796 = vmatpush1.bf16.msra.mxu0 %v3554_v61 }
 0x35d   :  { %2798 = vmatprep.subr.bf16.mxu0 %v3559_v17  ;;  %2828 = vmatpush3.bf16.msra.mxu1 %v3576_v58 }
 0x35e   :  { %2861 = vmatprep.subr.bf16.mxu1 %v3144_v34 }
 0x360   :  { %2800 = vmatpush1.bf16.msra.mxu0 %v3562_v40 }
 0x361   :  { %2802 = vmatprep.subr.bf16.mxu0 %v3568_v47 }
 0x364   :  { %2804 = vmatpush1.bf16.msra.mxu0 %v3572_v41 }
 0x365   :  { %2830 = vmatprep.subr.bf16.mxu0 %v3514_v44 }
 0x413   :  { %v1111_v63 = vpop.f32.mrb[6].mxu0  ;;  %v1182_v2 = vpop.f32.mrb[14].mxu1 }
 0x414   :  { %v3003_v5 = vadd.f32 %v1111_v63, %v3395_v62  ;;  %v1113_v7 = vpop.f32.mrb[7].mxu0  ;;  %v2408_v13 = vpop.f32.mrb[15].mxu1  ;;  %v1200_v9 = vadd.f32 %v3404_v26, %v1182_v2 }
 0x415   :  { %v3004_v15 = vadd.f32 %v1113_v7, %v3397_v1 }
 0x416   :  { %v2100_v8 = vmul.f32 -1.442695, %v3003_v5 }
 0x417   :  { %v2101_v21 = vmul.f32 -1.442695, %v3004_v15 }
 0x418   :  { %3066 = vpow2.f32 %v2100_v8 }
 0x419   :  { %3068 = vpow2.f32 %v2101_v21 }
 0x422   :  { %v3067_v28 = vpop.eup %3066 }
 0x423   :  { %v1190_v30 = vadd.f32 1.0, %v3067_v28  ;;  %v3069_v32 = vpop.eup %3068 }
 0x424   :  { %v1197_v33 = vadd.f32 1.0, %v3069_v32 }
 0x425   :  { %3070 = vrcp.f32 %v1190_v30 }
 0x426   :  { %3072 = vrcp.f32 %v1197_v33 }
 0x42f   :  { %v3071_v18 = vpop.eup %3070 }
 0x430   :  { %v1201_v25 = vmul.f32 %v3071_v18, %v1200_v9  ;;  %v3073_v37 = vpop.eup %3072 }
 0x431   :  { %v1204_v49 = vsub.f32 1.0, %v3073_v37  ;;  %v1206_v6 = vmul.f32 %v3073_v37, %v3497_v38  ;;  %v1432_v38 = vld [vmem:[#allocation3 + $0x28] sm:$0xff] }
 0x432   :  { %v1202_v27 = vadd.f32 %v1201_v25, %v3383_v43  ;;  %v1429_v43 = vld [vmem:[#allocation3 + $0x10] sm:$0xff] }
 0x433   :  { %v3615_v14 = vpack.c.bf16 %v1432_v38, %v1429_v43 }
 0x434   :  { %3074 = vtanh.f32 %v1202_v27 }
 0x43e   :  { %v3075_v50 = vpop.eup %3074 }
 0x43f   :  { %v1205_v59 = vmul.f32 %v3075_v50, %v1204_v49 }
 0x441   :  { %v3588_v10 = vadd.f32 %v1206_v6, %v1205_v59 }
 0x443   :  { %1208 = vst [vmem:[%s3746_s6 + $0x18] sm:$0xff] %v3588_v10  ;;  %1325 = vmatmul.mubr.f32.vlgmr.msra.gmra.mrb[8].mxu0 %v3588_v10  ;;  %2442 = vmatmul.mubr.f32.vlgmr.msra.gmra.mrb[16].mxu1 %v3588_v10 }
 0x444   :  { %2832 = vmatpush1.bf16.msra.mxu0 %v3516_v51  ;;  %1539 = vmatprep.mubr.f32.mxu0 %v3143_v0 }
 0x445   :  { %2834 = vmatprep.subr.bf16.mxu0 %v3520_v56  ;;  %2476 = vmatprep.mubr.msk.f32.mxu1 %vm3145_vm2, %v3143_v0 }
 0x446   :  { %2863 = vmatpush3.bf16.msra.mxu1 %v3615_v14 }
 0x447   :  { %2864 = vmatprep.subr.bf16.mxu1 %v3144_v34 }
 0x448   :  { %2836 = vmatpush1.bf16.msra.mxu0 %v3522_v36 }
 0x449   :  { %2838 = vmatprep.subr.bf16.mxu0 %v3526_v60 }
 0x44a   :  { %2866 = vmatpush3.bf16.msra.mxu1 %v3619_v29 }
 0x44b   :  { %2867 = vmatprep.subr.bf16.mxu1 %v3144_v34 }
 0x44c   :  { %2840 = vmatpush1.bf16.msra.mxu0 %v3528_v4 }
 0x44d   :  { %2842 = vmatprep.subr.bf16.mxu0 %v3532_v11 }
 0x44e   :  { %2869 = vmatpush3.bf16.msra.mxu1 %v3623_v53 }
 0x44f   :  { %2870 = vmatprep.subr.bf16.mxu1 %v3144_v34 }
 0x450   :  { %2844 = vmatpush1.bf16.msra.mxu0 %v3534_v16 }
 0x451   :  { %2846 = vmatprep.subr.bf16.mxu0 %v3541_v31 }
 0x452   :  { %2872 = vmatpush3.bf16.msra.mxu1 %v3537_v22 }
 0x453   :  { %2873 = vmatprep.subr.bf16.mxu1 %v3144_v34 }
 0x454   :  { %2848 = vmatpush1.bf16.msra.mxu0 %v3544_v12 }
 0x455   :  { %2850 = vmatprep.subr.bf16.mxu0 %v3551_v39 }
 0x456   :  { %2875 = vmatpush3.bf16.msra.mxu1 %v3547_v19 }
 0x457   :  { %2876 = vmatprep.subr.bf16.mxu1 %v3144_v34 }
 0x458   :  { %2852 = vmatpush1.bf16.msra.mxu0 %v3554_v61 }
 0x459   :  { %2854 = vmatprep.subr.bf16.mxu0 %v3559_v17 }
 0x45a   :  { %2878 = vmatpush3.bf16.msra.mxu1 %v3556_v3 }
 0x45b   :  { %2879 = vmatprep.subr.bf16.mxu1 %v3144_v34 }
 0x45c   :  { %2856 = vmatpush1.bf16.msra.mxu0 %v3562_v40 }
 0x45d   :  { %2858 = vmatprep.subr.bf16.mxu0 %v3568_v47 }
 0x45e   :  { %2881 = vmatpush3.bf16.msra.mxu1 %v3566_v35 }
 0x45f   :  { %2882 = vmatprep.subr.bf16.mxu1 %v3144_v34 }
 0x460   :  { %2860 = vmatpush1.bf16.msra.mxu0 %v3572_v41 }
 0x461   :  { %2886 = vmatprep.subr.bf16.mxu0 %v3514_v44 }
 0x462   :  { %2884 = vmatpush3.bf16.msra.mxu1 %v3576_v58 }
 0x463   :  { %2917 = vmatprep.subr.bf16.mxu1 %v3144_v34 }
 0x516   :  { %v1326_v45 = vpop.f32.mrb[8].mxu0  ;;  %v1397_v23 = vpop.f32.mrb[16].mxu1 }
 0x517   :  { %v3005_v55 = vadd.f32 %v1326_v45, %v3395_v62  ;;  %v1328_v63 = vpop.f32.mrb[9].mxu0  ;;  %v2443_v2 = vpop.f32.mrb[17].mxu1  ;;  %v1415_v30 = vadd.f32 %v3404_v26, %v1397_v23 }
 0x518   :  { %v3006_v7 = vadd.f32 %v1328_v63, %v3397_v1 }
 0x519   :  { %v2102_v5 = vmul.f32 -1.442695, %v3005_v55 }
 0x51a   :  { %v2103_v13 = vmul.f32 -1.442695, %v3006_v7 }
 0x51b   :  { %3076 = vpow2.f32 %v2102_v5 }
 0x51c   :  { %3078 = vpow2.f32 %v2103_v13 }
 0x525   :  { %v3077_v8 = vpop.eup %3076 }
 0x526   :  { %v1405_v15 = vadd.f32 1.0, %v3077_v8  ;;  %v3079_v21 = vpop.eup %3078 }
 0x527   :  { %v1412_v28 = vadd.f32 1.0, %v3079_v21 }
 0x528   :  { %3080 = vrcp.f32 %v1405_v15 }
 0x529   :  { %3082 = vrcp.f32 %v1412_v28 }
 0x532   :  { %v3081_v32 = vpop.eup %3080 }
 0x533   :  { %v1416_v33 = vmul.f32 %v3081_v32, %v1415_v30  ;;  %v3083_v18 = vpop.eup %3082 }
 0x534   :  { %v1419_v25 = vsub.f32 1.0, %v3083_v18  ;;  %v1421_v49 = vmul.f32 %v3083_v18, %v3588_v10 }
 0x535   :  { %v1417_v9 = vadd.f32 %v1416_v33, %v3389_v52 }
 0x537   :  { %3084 = vtanh.f32 %v1417_v9 }
 0x541   :  { %v3085_v27 = vpop.eup %3084 }
 0x542   :  { %v1420_v37 = vmul.f32 %v3085_v27, %v1419_v25 }
 0x544   :  { %v3642_v50 = vadd.f32 %v1421_v49, %v1420_v37 }
 0x546   :  { %1423 = vst [vmem:[%s3746_s6 + $0x20] sm:$0xff] %v3642_v50  ;;  %1540 = vmatmul.mubr.f32.vlgmr.msra.gmra.mrb[10].mxu0 %v3642_v50  ;;  %2477 = vmatmul.mubr.f32.vlgmr.msra.gmra.mrb[18].mxu1 %v3642_v50 }
 0x547   :  { %2888 = vmatpush1.bf16.msra.mxu0 %v3516_v51  ;;  %2919 = vmatpush3.bf16.msra.mxu1 %v3615_v14 }
 0x548   :  { %2890 = vmatprep.subr.bf16.mxu0 %v3520_v56  ;;  %2920 = vmatprep.subr.bf16.mxu1 %v3144_v34 }
 0x549   :  { %1754 = vmatprep.mubr.f32.mxu0 %v3143_v0  ;;  %2511 = vmatprep.mubr.msk.f32.mxu1 %vm3145_vm2, %v3143_v0 }
 0x54b   :  { %2892 = vmatpush1.bf16.msra.mxu0 %v3522_v36  ;;  %2922 = vmatpush3.bf16.msra.mxu1 %v3619_v29 }
 0x54c   :  { %2894 = vmatprep.subr.bf16.mxu0 %v3526_v60  ;;  %2923 = vmatprep.subr.bf16.mxu1 %v3144_v34 }
 0x54f   :  { %2896 = vmatpush1.bf16.msra.mxu0 %v3528_v4  ;;  %2925 = vmatpush3.bf16.msra.mxu1 %v3623_v53 }
 0x550   :  { %2898 = vmatprep.subr.bf16.mxu0 %v3532_v11  ;;  %2926 = vmatprep.subr.bf16.mxu1 %v3144_v34 }
 0x553   :  { %2900 = vmatpush1.bf16.msra.mxu0 %v3534_v16  ;;  %2928 = vmatpush3.bf16.msra.mxu1 %v3537_v22 }
 0x554   :  { %2902 = vmatprep.subr.bf16.mxu0 %v3541_v31  ;;  %2929 = vmatprep.subr.bf16.mxu1 %v3144_v34 }
 0x557   :  { %2904 = vmatpush1.bf16.msra.mxu0 %v3544_v12  ;;  %2931 = vmatpush3.bf16.msra.mxu1 %v3547_v19 }
 0x558   :  { %2906 = vmatprep.subr.bf16.mxu0 %v3551_v39  ;;  %2932 = vmatprep.subr.bf16.mxu1 %v3144_v34 }
 0x55b   :  { %2908 = vmatpush1.bf16.msra.mxu0 %v3554_v61  ;;  %2934 = vmatpush3.bf16.msra.mxu1 %v3556_v3 }
 0x55c   :  { %2910 = vmatprep.subr.bf16.mxu0 %v3559_v17  ;;  %2935 = vmatprep.subr.bf16.mxu1 %v3144_v34 }
 0x55f   :  { %2912 = vmatpush1.bf16.msra.mxu0 %v3562_v40  ;;  %2937 = vmatpush3.bf16.msra.mxu1 %v3566_v35 }
 0x560   :  { %2914 = vmatprep.subr.bf16.mxu0 %v3568_v47  ;;  %2938 = vmatprep.subr.bf16.mxu1 %v3144_v34 }
 0x563   :  { %2916 = vmatpush1.bf16.msra.mxu0 %v3572_v41  ;;  %2940 = vmatpush3.bf16.msra.mxu1 %v3576_v58 }
 0x564   :  { %2942 = vmatprep.subr.bf16.mxu0 %v3514_v44  ;;  %2973 = vmatprep.subr.bf16.mxu1 %v3144_v34 }
 0x619   :  { %v1541_v52 = vpop.f32.mrb[10].mxu0  ;;  %v1612_v59 = vpop.f32.mrb[18].mxu1 }
 0x61a   :  { %v3007_v6 = vadd.f32 %v1541_v52, %v3395_v62  ;;  %v1543_v10 = vpop.f32.mrb[11].mxu0  ;;  %v2478_v43 = vpop.f32.mrb[19].mxu1  ;;  %v1630_v44 = vadd.f32 %v3404_v26, %v1612_v59 }
 0x61b   :  { %v3008_v20 = vadd.f32 %v1543_v10, %v3397_v1 }
 0x61c   :  { %v2104_v38 = vmul.f32 -1.442695, %v3007_v6 }
 0x61d   :  { %v2105_v24 = vmul.f32 -1.442695, %v3008_v20 }
 0x61e   :  { %3086 = vpow2.f32 %v2104_v38 }
 0x61f   :  { %3088 = vpow2.f32 %v2105_v24 }
 0x628   :  { %v3087_v46 = vpop.eup %3086 }
 0x629   :  { %v1620_v42 = vadd.f32 1.0, %v3087_v46  ;;  %v3089_v45 = vpop.eup %3088 }
 0x62a   :  { %v1627_v23 = vadd.f32 1.0, %v3089_v45 }
 0x62b   :  { %3090 = vrcp.f32 %v1620_v42 }
 0x62c   :  { %3092 = vrcp.f32 %v1627_v23 }
 0x635   :  { %v3091_v55 = vpop.eup %3090 }
 0x636   :  { %v1631_v63 = vmul.f32 %v3091_v55, %v1630_v44  ;;  %v3093_v5 = vpop.eup %3092 }
 0x637   :  { %v1634_v7 = vsub.f32 1.0, %v3093_v5  ;;  %v1636_v15 = vmul.f32 %v3093_v5, %v3642_v50 }
 0x638   :  { %v1632_v2 = vadd.f32 %v1631_v63, %v3387_v48 }
 0x63a   :  { %3094 = vtanh.f32 %v1632_v2 }
 0x644   :  { %v3095_v13 = vpop.eup %3094 }
 0x645   :  { %v1635_v8 = vmul.f32 %v3095_v13, %v1634_v7 }
 0x647   :  { %v1637_v21 = vadd.f32 %v1636_v15, %v1635_v8 }
 0x649   :  { %1638 = vst [vmem:[%s3746_s6 + $0x28] sm:$0xff] %v1637_v21  ;;  %1755 = vmatmul.mubr.f32.vlgmr.msra.gmra.mrb[12].mxu0 %v1637_v21  ;;  %2512 = vmatmul.mubr.f32.vlgmr.msra.gmra.mrb[20].mxu1 %v1637_v21 }
 0x64a   :  { %2944 = vmatpush1.bf16.msra.mxu0 %v3516_v51  ;;  %2975 = vmatpush3.bf16.msra.mxu1 %v3615_v14 }
 0x64b   :  { %2946 = vmatprep.subr.bf16.mxu0 %v3520_v56  ;;  %2976 = vmatprep.subr.bf16.mxu1 %v3144_v34 }
 0x64c   :  { %1969 = vmatprep.mubr.f32.mxu0 %v3143_v0  ;;  %2546 = vmatprep.mubr.msk.f32.mxu1 %vm3145_vm2, %v3143_v0 }
 0x64e   :  { %2948 = vmatpush1.bf16.msra.mxu0 %v3522_v36  ;;  %2978 = vmatpush3.bf16.msra.mxu1 %v3619_v29 }
 0x64f   :  { %2950 = vmatprep.subr.bf16.mxu0 %v3526_v60  ;;  %2979 = vmatprep.subr.bf16.mxu1 %v3144_v34 }
 0x652   :  { %2952 = vmatpush1.bf16.msra.mxu0 %v3528_v4  ;;  %2981 = vmatpush3.bf16.msra.mxu1 %v3623_v53 }
 0x653   :  { %2954 = vmatprep.subr.bf16.mxu0 %v3532_v11  ;;  %2982 = vmatprep.subr.bf16.mxu1 %v3144_v34 }
 0x656   :  { %2956 = vmatpush1.bf16.msra.mxu0 %v3534_v16  ;;  %2984 = vmatpush3.bf16.msra.mxu1 %v3537_v22 }
 0x657   :  { %2958 = vmatprep.subr.bf16.mxu0 %v3541_v31  ;;  %2985 = vmatprep.subr.bf16.mxu1 %v3144_v34 }
 0x65a   :  { %2960 = vmatpush1.bf16.msra.mxu0 %v3544_v12  ;;  %2987 = vmatpush3.bf16.msra.mxu1 %v3547_v19 }
 0x65b   :  { %2962 = vmatprep.subr.bf16.mxu0 %v3551_v39  ;;  %2988 = vmatprep.subr.bf16.mxu1 %v3144_v34 }
 0x65e   :  { %2964 = vmatpush1.bf16.msra.mxu0 %v3554_v61  ;;  %2990 = vmatpush3.bf16.msra.mxu1 %v3556_v3 }
 0x65f   :  { %2966 = vmatprep.subr.bf16.mxu0 %v3559_v17  ;;  %2991 = vmatprep.subr.bf16.mxu1 %v3144_v34 }
 0x662   :  { %2968 = vmatpush1.bf16.msra.mxu0 %v3562_v40  ;;  %2993 = vmatpush3.bf16.msra.mxu1 %v3566_v35 }
 0x663   :  { %2970 = vmatprep.subr.bf16.mxu0 %v3568_v47  ;;  %2994 = vmatprep.subr.bf16.mxu1 %v3144_v34 }
 0x666   :  { %2972 = vmatpush1.bf16.msra.mxu0 %v3572_v41  ;;  %2996 = vmatpush3.bf16.msra.mxu1 %v3576_v58 }
 0x71c   :  { %v1756_v0 = vpop.f32.mrb[12].mxu0  ;;  %v1827_v48 = vpop.f32.mrb[20].mxu1 }
 0x71d   :  { %v3009_v51 = vadd.f32 %v1756_v0, %v3395_v62  ;;  %v1758_v56 = vpop.f32.mrb[13].mxu0  ;;  %v2513_v36 = vpop.f32.mrb[21].mxu1  ;;  %v1845_v12 = vadd.f32 %v3404_v26, %v1827_v48 }
 0x71e   :  { %v3010_v4 = vadd.f32 %v1758_v56, %v3397_v1 }
 0x71f   :  { %v2106_v60 = vmul.f32 -1.442695, %v3009_v51 }
 0x720   :  { %v2107_v11 = vmul.f32 -1.442695, %v3010_v4 }
 0x721   :  { %3096 = vpow2.f32 %v2106_v60 }
 0x722   :  { %3098 = vpow2.f32 %v2107_v11 }
 0x72b   :  { %v3097_v16 = vpop.eup %3096 }
 0x72c   :  { %v1835_v22 = vadd.f32 1.0, %v3097_v16  ;;  %v3099_v34 = vpop.eup %3098 }
 0x72d   :  { %v1842_v31 = vadd.f32 1.0, %v3099_v34 }
 0x72e   :  { %3100 = vrcp.f32 %v1835_v22 }
 0x72f   :  { %3102 = vrcp.f32 %v1842_v31 }
 0x738   :  { %v3101_v19 = vpop.eup %3100 }
 0x739   :  { %v1846_v39 = vmul.f32 %v3101_v19, %v1845_v12  ;;  %v3103_v3 = vpop.eup %3102 }
 0x73a   :  { %v1849_v17 = vsub.f32 1.0, %v3103_v3  ;;  %v1851_v47 = vmul.f32 %v3103_v3, %v1637_v21 }
 0x73b   :  { %v1847_v61 = vadd.f32 %v1846_v39, %v3393_v57 }
 0x73d   :  { %3104 = vtanh.f32 %v1847_v61 }
 0x747   :  { %v3105_v40 = vpop.eup %3104 }
 0x748   :  { %v1850_v35 = vmul.f32 %v3105_v40, %v1849_v17 }
 0x74a   :  { %v1852_v41 = vadd.f32 %v1851_v47, %v1850_v35 }
 0x74c   :  { %1853 = vst [vmem:[%s3746_s6 + $0x30] sm:$0xff] %v1852_v41  ;;  %1970 = vmatmul.mubr.f32.vlgmr.msra.gmra.mrb[14].mxu0 %v1852_v41  ;;  %2547 = vmatmul.mubr.f32.vlgmr.msra.gmra.mrb[22].mxu1 %v1852_v41 }
 0x81f   :  { %v1971_v58 = vpop.f32.mrb[14].mxu0  ;;  %v2042_v14 = vpop.f32.mrb[22].mxu1 }
 0x820   :  { %v3011_v29 = vadd.f32 %v1971_v58, %v3395_v62  ;;  %v1973_v53 = vpop.f32.mrb[15].mxu0  ;;  %v2548_v28 = vpop.f32.mrb[23].mxu1  ;;  %v2060_v27 = vadd.f32 %v3404_v26, %v2042_v14 }
 0x821   :  { %v3012_v30 = vadd.f32 %v1973_v53, %v3397_v1 }
 0x822   :  { %v2108_v57 = vmul.f32 -1.442695, %v3011_v29 }
 0x823   :  { %v2109_v32 = vmul.f32 -1.442695, %v3012_v30 }
 0x824   :  { %3106 = vpow2.f32 %v2108_v57 }
 0x825   :  { %3108 = vpow2.f32 %v2109_v32 }
 0x82e   :  { %v3107_v33 = vpop.eup %3106 }
 0x82f   :  { %v2050_v9 = vadd.f32 1.0, %v3107_v33  ;;  %v3109_v18 = vpop.eup %3108 }
 0x830   :  { %v2057_v25 = vadd.f32 1.0, %v3109_v18 }
 0x831   :  { %3110 = vrcp.f32 %v2050_v9 }
 0x832   :  { %3112 = vrcp.f32 %v2057_v25 }
 0x83b   :  { %v3111_v37 = vpop.eup %3110 }
 0x83c   :  { %v2061_v49 = vmul.f32 %v3111_v37, %v2060_v27  ;;  %v3113_v50 = vpop.eup %3112 }
 0x83d   :  { %v2064_v52 = vsub.f32 1.0, %v3113_v50  ;;  %v2066_v6 = vmul.f32 %v3113_v50, %v1852_v41 }
 0x83e   :  { %v2062_v62 = vadd.f32 %v2061_v49, %v3391_v54 }
 0x840   :  { %3114 = vtanh.f32 %v2062_v62 }
 0x84a   :  { %v3115_v59 = vpop.eup %3114 }
 0x84b   :  { %v2065_v1 = vmul.f32 %v3115_v59, %v2064_v52 }
 0x84d   :  { %v2067_v10 = vadd.f32 %v2066_v6, %v2065_v1 }
 0x84f   :  { %2068 = vst [vmem:[%s3746_s6 + $0x38] sm:$0xff] %v2067_v10 }
 0x850   :  { %2073 = vsyncpa [#allocation4], 1 }

</bundles_post_ra>
